<compile_context>
chip_gen: v7x
topology: tpu7x:2x2x1
jax: 0.10.0
libtpu: 0.0.40
codegen_flags: <defaults>
</compile_context>

<pallas_src>
import functools

import jax
import jax.numpy as jnp
from jax.experimental import pallas as pl
from jax.experimental.pallas import tpu as pltpu

BN_EPS = 1e-5


def _round_up(x, m):
    return (x + m - 1) // m * m


# -------------------------------- Pallas kernel -------------------------------
def hydranet_kernel(x_ref,                         # (Cin_pad, rows)
                    mask_ref,                      # (9, rows) tap validity masks
                    seg_ref,                       # (rows, B) per-sample sum matrix
                    w1_ref, g1_ref, b1_ref,        # (C1, 9*Cin_pad), (C1,1), (C1,1)
                    w2_ref, g2_ref, b2_ref,        # (nH*C2, 9*C1), (nH*C2,1), (nH*C2,1)
                    wmat_ref,                      # (nH*C2, B) normalized Dirichlet wts
                    wfc_ref, bfc_ref,              # (nH*nc, nH*C2) block-diag, (nH*nc,1)
                    out_ref,                       # (nH*nc, B)
                    taps_ref,                      # VMEM scratch (K_max, rows)
                    *, batch, height, width, cin_p, c1):
    rows = batch * height * width
    hw = height * width
    n = float(rows)

    seg = seg_ref[...]                             # (rows, B), 1.0 segment membership

    def conv3x3(src, w_flat_ref, c_in):
        # 3x3 pad=1 conv in (C, rows) layout: stack 9 shifted+masked taps into the
        # shared VMEM scratch, then a single K = 9*c_in MXU matmul.
        for k in range(9):
            dh, dw = k // 3 - 1, k % 3 - 1
            if dh == 0 and dw == 0:
                taps_ref[k * c_in:(k + 1) * c_in, :] = src
            else:
                shift = (-(dh * width + dw)) % rows
                tap = pltpu.roll(src, shift, axis=1)
                taps_ref[k * c_in:(k + 1) * c_in, :] = tap * mask_ref[k:k + 1, :]
        return jnp.dot(w_flat_ref[...], taps_ref[:9 * c_in, :],
                       preferred_element_type=jnp.float32)

    # ---- shared trunk: conv -> BatchNorm2d (train, biased var) -> ReLU -------
    conv1 = conv3x3(x_ref[...], w1_ref, cin_p)                        # (C1, rows)
    # full-batch sums via the MXU (tiny (C1, B) lane-reduce afterwards)
    t1 = jnp.dot(conv1, seg, preferred_element_type=jnp.float32)      # (C1, B)
    t2 = jnp.dot(conv1 * conv1, seg, preferred_element_type=jnp.float32)
    s1 = jnp.sum(t1, axis=1, keepdims=True)
    s2 = jnp.sum(t2, axis=1, keepdims=True)
    mu = s1 * (1.0 / n)
    var = jnp.maximum(s2 * (1.0 / n) - mu * mu, 0.0)                  # biased batch var
    t = g1_ref[...] * ((conv1 - mu) * jax.lax.rsqrt(var + BN_EPS)) + b1_ref[...]
    t = jnp.maximum(t, 0.0)

    # ---- all heads stacked: conv -> weighted BN -> ReLU -> pool -> fc --------
    conv2 = conv3x3(t, w2_ref, c1)                                    # (nH*C2, rows)
    S = jnp.dot(conv2, seg, preferred_element_type=jnp.float32)       # per-sample sums
    Q = jnp.dot(conv2 * conv2, seg, preferred_element_type=jnp.float32)

    wmat = wmat_ref[...]                                              # (nH*C2, B)
    mu2 = jnp.sum(wmat * S, axis=1, keepdims=True) * (1.0 / n)
    ev2 = jnp.sum((wmat * wmat) * Q, axis=1, keepdims=True)
    var2 = jnp.maximum((ev2 - n * mu2 * mu2) / (n - 1.0), 0.0)        # unbiased, weighted
    inv_std = pl.reciprocal(jnp.sqrt(var2) + BN_EPS)                  # eps added to std
    y = g2_ref[...] * ((conv2 - mu2) * inv_std) + b2_ref[...]
    y = jnp.maximum(y, 0.0)

    pooled = jnp.dot(y, seg, preferred_element_type=jnp.float32) * (1.0 / hw)  # (nH*C2, B)
    out_ref[...] = (jnp.dot(wfc_ref[...], pooled,
                            preferred_element_type=jnp.float32) + bfc_ref[...])


# ---------------------------------- wrapper -----------------------------------
def hydranet_forward(x_nchw, params):
    B, cin, H, W = x_nchw.shape
    rows = B * H * W
    hw = H * W
    n_heads = params["n_heads"]
    c1 = params["w1"].shape[1]
    c2 = params["c2"]
    nc = params["num_classes"]

    cin_p = _round_up(cin, 8)                      # sublane-align input channels

    # lane-dense transposed activation layout: (C, B*H*W), rows (multiple of 128) last
    x_t = jnp.transpose(x_nchw, (1, 0, 2, 3)).reshape(cin, rows)
    x_t = jnp.pad(x_t, ((0, cin_p - cin), (0, 0)))

    # flattened conv weights matching the tap-stack layout: (Cout, 9*Cin)
    w1 = jnp.pad(params["w1"], ((0, 0), (0, 0), (0, cin_p - cin)))    # (9, C1, Cin_p)
    w1_flat = jnp.transpose(w1, (1, 0, 2)).reshape(c1, 9 * cin_p)
    w2_flat = jnp.transpose(params["w2"], (1, 0, 2)).reshape(n_heads * c2, 9 * c1)

    # hoisted 3x3/pad=1 validity masks per tap (shared by trunk and head conv)
    col = jnp.arange(rows, dtype=jnp.int32)
    hh = (col // W) % H
    ww = col % W
    mask_rows = []
    for k in range(9):
        dh, dw = k // 3 - 1, k % 3 - 1
        valid = ((hh + dh >= 0) & (hh + dh < H) & (ww + dw >= 0) & (ww + dw < W))
        mask_rows.append(valid.astype(jnp.float32))
    mask = jnp.stack(mask_rows)                                        # (9, rows)

    # per-sample sum matrix: 1.0 where column belongs to sample b (MXU reductions/pool)
    seg = (col[:, None] // hw == jnp.arange(B, dtype=jnp.int32)[None, :]
           ).astype(jnp.float32)                                       # (rows, B)

    # normalized per-sample Dirichlet weights broadcast to the stacked channel axis
    wts_n = params["wts"] / jnp.sum(params["wts"], axis=1, keepdims=True)  # (nH, B)
    wmat = jnp.repeat(wts_n, c2, axis=0)                               # (nH*C2, B)

    # block-diagonal fc: all heads' logits become one matmul
    wfc_blk = jnp.zeros((n_heads * nc, n_heads * c2), jnp.float32)
    for h in range(n_heads):
        wfc_blk = wfc_blk.at[h * nc:(h + 1) * nc,
                             h * c2:(h + 1) * c2].set(params["wfc"][h])
    bfc_all = params["bfc"].reshape(n_heads * nc, 1)
    g2_all = params["g2"].reshape(n_heads * c2, 1)
    b2_all = params["b2"].reshape(n_heads * c2, 1)

    k_max = max(9 * cin_p, 9 * c1)

    arrays = (x_t, mask, seg, w1_flat, params["g1"], params["b1"], w2_flat,
              g2_all, b2_all, wmat, wfc_blk, bfc_all)
    nbytes = sum(int(a.size) * a.dtype.itemsize for a in arrays) + n_heads * nc * B * 4
    flops = (2 * rows * (9 * cin_p * c1 + 9 * c1 * n_heads * c2
                         + B * (2 * c1 + 3 * n_heads * c2))
             + 2 * n_heads * nc * n_heads * c2 * B)

    kernel = functools.partial(hydranet_kernel, batch=B, height=H, width=W,
                               cin_p=cin_p, c1=c1)
    vmem = pl.BlockSpec(memory_space=pltpu.MemorySpace.VMEM)

    out = pl.pallas_call(
        kernel,
        out_shape=jax.ShapeDtypeStruct((n_heads * nc, B), jnp.float32),
        in_specs=[vmem] * 12,
        out_specs=vmem,
        scratch_shapes=[pltpu.VMEM((k_max, rows), jnp.float32)],
        compiler_params=pltpu.CompilerParams(vmem_limit_bytes=32 * 1024 * 1024),
        cost_estimate=pl.CostEstimate(flops=flops, transcendentals=64,
                                      bytes_accessed=nbytes),
    )(x_t, mask, seg, w1_flat, params["g1"], params["b1"], w2_flat,
      g2_all, b2_all, wmat, wfc_blk, bfc_all)

    out = out.reshape(n_heads, nc, B)
    return [out[h].T for h in range(n_heads)]      # each (B, num_classes)


# ------------------------------ parameter init --------------------------------
def init_params(key, *, cin=4, c1=8, c2=16, num_classes=10, n_heads=2, batch=2):
    keys = jax.random.split(key, 1 + n_heads)
    w1 = jax.random.normal(keys[0], (9, c1, cin), jnp.float32) * 0.1
    w2s, wfcs, bfcs, wtss = [], [], [], []
    for i in range(n_heads):
        hk = jax.random.split(keys[1 + i], 4)
        w2s.append(jax.random.normal(hk[0], (9, c2, c1), jnp.float32) * 0.1)
        # sample_wts: Dirichlet(1,...,1) per head (HydraNet.__init__)
        wtss.append(jax.random.dirichlet(hk[1], jnp.ones((batch,), jnp.float32)))
        wfcs.append(jax.random.normal(hk[2], (num_classes, c2), jnp.float32) * 0.1)
        bfcs.append(jax.random.normal(hk[3], (num_classes, 1), jnp.float32) * 0.01)
    return {
        "w1": w1,                                     # (9, C1, Cin)
        "g1": jnp.ones((c1, 1), jnp.float32),
        "b1": jnp.zeros((c1, 1), jnp.float32),
        "w2": jnp.concatenate(w2s, axis=1),           # (9, n_heads*C2, C1)
        "g2": jnp.ones((n_heads, c2, 1), jnp.float32),
        "b2": jnp.zeros((n_heads, c2, 1), jnp.float32),
        "wfc": jnp.stack(wfcs),                       # (n_heads, nc, C2)
        "bfc": jnp.stack(bfcs),                       # (n_heads, nc, 1)
        "wts": jnp.stack(wtss),                       # (n_heads, B)
        "n_heads": n_heads,
        "c2": c2,
        "num_classes": num_classes,
    }


# ----------------------------- reference (plain jnp) --------------------------
def _ref_forward(x, params):
    B, cin, H, W = x.shape
    n = B * H * W
    c2 = params["c2"]
    n_heads = params["n_heads"]
    hi = jax.lax.Precision.HIGHEST

    def conv3x3_nchw(inp, w):                         # w: (9, Cout, Cin)
        xp = jnp.pad(inp, ((0, 0), (0, 0), (1, 1), (1, 1)))
        out = jnp.zeros((inp.shape[0], w.shape[1], H, W), jnp.float32)
        for k in range(9):
            kh, kw = k // 3, k % 3
            out = out + jnp.einsum("oc,bchw->bohw", w[k],
                                   xp[:, :, kh:kh + H, kw:kw + W], precision=hi)
        return out

    c = conv3x3_nchw(x, params["w1"])
    mu = c.mean(axis=(0, 2, 3), keepdims=True)
    var = ((c - mu) ** 2).mean(axis=(0, 2, 3), keepdims=True)
    g1 = params["g1"].reshape(1, -1, 1, 1)
    b1 = params["b1"].reshape(1, -1, 1, 1)
    t = jnp.maximum(g1 * (c - mu) / jnp.sqrt(var + BN_EPS) + b1, 0.0)

    outs = []
    for h in range(n_heads):
        w2h = params["w2"][:, h * c2:(h + 1) * c2, :]
        ch = conv3x3_nchw(t, w2h)                     # (B, C2, H, W)
        wn = params["wts"][h] / params["wts"][h].sum()
        v = ch * wn[:, None, None, None]
        muw = v.mean(axis=(0, 2, 3), keepdims=True)
        varw = ((v - muw) ** 2).sum(axis=(0, 2, 3), keepdims=True) / (n - 1)
        g = params["g2"][h].reshape(1, -1, 1, 1)
        bb = params["b2"][h].reshape(1, -1, 1, 1)
        y = jnp.maximum(g * (ch - muw) / (jnp.sqrt(varw) + BN_EPS) + bb, 0.0)
        pooled = y.mean(axis=(2, 3))                  # (B, C2)
        outs.append(jnp.dot(pooled, params["wfc"][h].T, precision=hi)
                    + params["bfc"][h][:, 0])
    return outs


# ------------------------------------ main -------------------------------------
if __name__ == "__main__":
    key = jax.random.PRNGKey(0)
    kx, kp = jax.random.split(key)
    B, Cin, H, W = 2, 4, 16, 16
    n_heads, num_classes = 2, 10

    x = jax.random.normal(kx, (B, Cin, H, W), jnp.float32)
    params = init_params(kp, cin=Cin, c1=8, c2=16, num_classes=num_classes,
                         n_heads=n_heads, batch=B)

    outs = hydranet_forward(x, params)
    outs = jax.block_until_ready(outs)

    refs = _ref_forward(x, params)
    for o, r in zip(outs, refs):
        assert o.shape == (B, num_classes)
        err = float(jnp.max(jnp.abs(o - r)))
        assert jnp.allclose(o, r, atol=5e-3, rtol=5e-3), err

    print("KERNEL_OK")
</pallas_src>

<mosaic_0001>
module attributes {stable_mosaic.version = 11 : i64} {
  func.func @hydranet_kernel(%arg0: memref<8x512xf32, #tpu.memory_space<vmem>>, %arg1: memref<9x512xf32, #tpu.memory_space<vmem>>, %arg2: memref<512x2xf32, #tpu.memory_space<vmem>>, %arg3: memref<8x72xf32, #tpu.memory_space<vmem>>, %arg4: memref<8x1xf32, #tpu.memory_space<vmem>>, %arg5: memref<8x1xf32, #tpu.memory_space<vmem>>, %arg6: memref<32x72xf32, #tpu.memory_space<vmem>>, %arg7: memref<32x1xf32, #tpu.memory_space<vmem>>, %arg8: memref<32x1xf32, #tpu.memory_space<vmem>>, %arg9: memref<32x2xf32, #tpu.memory_space<vmem>>, %arg10: memref<20x32xf32, #tpu.memory_space<vmem>>, %arg11: memref<20x1xf32, #tpu.memory_space<vmem>>, %arg12: memref<20x2xf32, #tpu.memory_space<vmem>>, %arg13: memref<72x512xf32, #tpu.memory_space<vmem>>) attributes {dimension_semantics = [], scalar_prefetch = 0 : i64, scratch_operands = 1 : i64, tpu.core_type = #tpu.core_type<tc>} {
    %c0 = arith.constant 0 : index
    %c0_0 = arith.constant 0 : index
    %0 = vector.load %arg2[%c0, %c0_0] : memref<512x2xf32, #tpu.memory_space<vmem>>, vector<512x2xf32>
    %c0_1 = arith.constant 0 : index
    %c0_2 = arith.constant 0 : index
    %1 = vector.load %arg0[%c0_1, %c0_2] : memref<8x512xf32, #tpu.memory_space<vmem>>, vector<8x512xf32>
    %c17_i32 = arith.constant 17 : i32
    %2 = tpu.dynamic_rotate %1 by %c17_i32 dim 1 : vector<8x512xf32>, i32 -> vector<8x512xf32>
    %c0_3 = arith.constant 0 : index
    %c0_4 = arith.constant 0 : index
    %3 = vector.load %arg1[%c0_3, %c0_4] : memref<9x512xf32, #tpu.memory_space<vmem>>, vector<1x512xf32>
    %4 = vector.broadcast %3 : vector<1x512xf32> to vector<8x512xf32>
    %5 = arith.mulf %2, %4 : vector<8x512xf32>
    %c0_5 = arith.constant 0 : index
    %c0_6 = arith.constant 0 : index
    %6 = vector.load %arg13[%c0_5, %c0_6] : memref<72x512xf32, #tpu.memory_space<vmem>>, vector<8x512xf32>
    tpu.vector_store %arg13[%c0_5, %c0_6], %5 {strides = array<i32>} : memref<72x512xf32, #tpu.memory_space<vmem>>, vector<8x512xf32>,
    %c16_i32 = arith.constant 16 : i32
    %7 = tpu.dynamic_rotate %1 by %c16_i32 dim 1 : vector<8x512xf32>, i32 -> vector<8x512xf32>
    %c1 = arith.constant 1 : index
    %c0_7 = arith.constant 0 : index
    %8 = vector.load %arg1[%c1, %c0_7] : memref<9x512xf32, #tpu.memory_space<vmem>>, vector<1x512xf32>
    %9 = vector.broadcast %8 : vector<1x512xf32> to vector<8x512xf32>
    %10 = arith.mulf %7, %9 : vector<8x512xf32>
    %c8 = arith.constant 8 : index
    %c0_8 = arith.constant 0 : index
    %11 = vector.load %arg13[%c8, %c0_8] : memref<72x512xf32, #tpu.memory_space<vmem>>, vector<8x512xf32>
    tpu.vector_store %arg13[%c8, %c0_8], %10 {strides = array<i32>} : memref<72x512xf32, #tpu.memory_space<vmem>>, vector<8x512xf32>,
    %c15_i32 = arith.constant 15 : i32
    %12 = tpu.dynamic_rotate %1 by %c15_i32 dim 1 : vector<8x512xf32>, i32 -> vector<8x512xf32>
    %c2 = arith.constant 2 : index
    %c0_9 = arith.constant 0 : index
    %13 = vector.load %arg1[%c2, %c0_9] : memref<9x512xf32, #tpu.memory_space<vmem>>, vector<1x512xf32>
    %14 = vector.broadcast %13 : vector<1x512xf32> to vector<8x512xf32>
    %15 = arith.mulf %12, %14 : vector<8x512xf32>
    %c16 = arith.constant 16 : index
    %c0_10 = arith.constant 0 : index
    %16 = vector.load %arg13[%c16, %c0_10] : memref<72x512xf32, #tpu.memory_space<vmem>>, vector<8x512xf32>
    tpu.vector_store %arg13[%c16, %c0_10], %15 {strides = array<i32>} : memref<72x512xf32, #tpu.memory_space<vmem>>, vector<8x512xf32>,
    %c1_i32 = arith.constant 1 : i32
    %17 = tpu.dynamic_rotate %1 by %c1_i32 dim 1 : vector<8x512xf32>, i32 -> vector<8x512xf32>
    %c3 = arith.constant 3 : index
    %c0_11 = arith.constant 0 : index
    %18 = vector.load %arg1[%c3, %c0_11] : memref<9x512xf32, #tpu.memory_space<vmem>>, vector<1x512xf32>
    %19 = vector.broadcast %18 : vector<1x512xf32> to vector<8x512xf32>
    %20 = arith.mulf %17, %19 : vector<8x512xf32>
    %c24 = arith.constant 24 : index
    %c0_12 = arith.constant 0 : index
    %21 = vector.load %arg13[%c24, %c0_12] : memref<72x512xf32, #tpu.memory_space<vmem>>, vector<8x512xf32>
    tpu.vector_store %arg13[%c24, %c0_12], %20 {strides = array<i32>} : memref<72x512xf32, #tpu.memory_space<vmem>>, vector<8x512xf32>,
    %c32 = arith.constant 32 : index
    %c0_13 = arith.constant 0 : index
    %22 = vector.load %arg13[%c32, %c0_13] : memref<72x512xf32, #tpu.memory_space<vmem>>, vector<8x512xf32>
    tpu.vector_store %arg13[%c32, %c0_13], %1 {strides = array<i32>} : memref<72x512xf32, #tpu.memory_space<vmem>>, vector<8x512xf32>,
    %c511_i32 = arith.constant 511 : i32
    %23 = tpu.dynamic_rotate %1 by %c511_i32 dim 1 : vector<8x512xf32>, i32 -> vector<8x512xf32>
    %c5 = arith.constant 5 : index
    %c0_14 = arith.constant 0 : index
    %24 = vector.load %arg1[%c5, %c0_14] : memref<9x512xf32, #tpu.memory_space<vmem>>, vector<1x512xf32>
    %25 = vector.broadcast %24 : vector<1x512xf32> to vector<8x512xf32>
    %26 = arith.mulf %23, %25 : vector<8x512xf32>
    %c40 = arith.constant 40 : index
    %c0_15 = arith.constant 0 : index
    %27 = vector.load %arg13[%c40, %c0_15] : memref<72x512xf32, #tpu.memory_space<vmem>>, vector<8x512xf32>
    tpu.vector_store %arg13[%c40, %c0_15], %26 {strides = array<i32>} : memref<72x512xf32, #tpu.memory_space<vmem>>, vector<8x512xf32>,
    %c497_i32 = arith.constant 497 : i32
    %28 = tpu.dynamic_rotate %1 by %c497_i32 dim 1 : vector<8x512xf32>, i32 -> vector<8x512xf32>
    %c6 = arith.constant 6 : index
    %c0_16 = arith.constant 0 : index
    %29 = vector.load %arg1[%c6, %c0_16] : memref<9x512xf32, #tpu.memory_space<vmem>>, vector<1x512xf32>
    %30 = vector.broadcast %29 : vector<1x512xf32> to vector<8x512xf32>
    %31 = arith.mulf %28, %30 : vector<8x512xf32>
    %c48 = arith.constant 48 : index
    %c0_17 = arith.constant 0 : index
    %32 = vector.load %arg13[%c48, %c0_17] : memref<72x512xf32, #tpu.memory_space<vmem>>, vector<8x512xf32>
    tpu.vector_store %arg13[%c48, %c0_17], %31 {strides = array<i32>} : memref<72x512xf32, #tpu.memory_space<vmem>>, vector<8x512xf32>,
    %c496_i32 = arith.constant 496 : i32
    %33 = tpu.dynamic_rotate %1 by %c496_i32 dim 1 : vector<8x512xf32>, i32 -> vector<8x512xf32>
    %c7 = arith.constant 7 : index
    %c0_18 = arith.constant 0 : index
    %34 = vector.load %arg1[%c7, %c0_18] : memref<9x512xf32, #tpu.memory_space<vmem>>, vector<1x512xf32>
    %35 = vector.broadcast %34 : vector<1x512xf32> to vector<8x512xf32>
    %36 = arith.mulf %33, %35 : vector<8x512xf32>
    %c56 = arith.constant 56 : index
    %c0_19 = arith.constant 0 : index
    %37 = vector.load %arg13[%c56, %c0_19] : memref<72x512xf32, #tpu.memory_space<vmem>>, vector<8x512xf32>
    tpu.vector_store %arg13[%c56, %c0_19], %36 {strides = array<i32>} : memref<72x512xf32, #tpu.memory_space<vmem>>, vector<8x512xf32>,
    %c495_i32 = arith.constant 495 : i32
    %38 = tpu.dynamic_rotate %1 by %c495_i32 dim 1 : vector<8x512xf32>, i32 -> vector<8x512xf32>
    %c8_20 = arith.constant 8 : index
    %c0_21 = arith.constant 0 : index
    %39 = vector.load %arg1[%c8_20, %c0_21] : memref<9x512xf32, #tpu.memory_space<vmem>>, vector<1x512xf32>
    %40 = vector.broadcast %39 : vector<1x512xf32> to vector<8x512xf32>
    %41 = arith.mulf %38, %40 : vector<8x512xf32>
    %c64 = arith.constant 64 : index
    %c0_22 = arith.constant 0 : index
    %42 = vector.load %arg13[%c64, %c0_22] : memref<72x512xf32, #tpu.memory_space<vmem>>, vector<8x512xf32>
    tpu.vector_store %arg13[%c64, %c0_22], %41 {strides = array<i32>} : memref<72x512xf32, #tpu.memory_space<vmem>>, vector<8x512xf32>,
    %c0_23 = arith.constant 0 : index
    %c0_24 = arith.constant 0 : index
    %43 = vector.load %arg3[%c0_23, %c0_24] : memref<8x72xf32, #tpu.memory_space<vmem>>, vector<8x72xf32>
    %c0_25 = arith.constant 0 : index
    %c0_26 = arith.constant 0 : index
    %44 = vector.load %arg13[%c0_25, %c0_26] : memref<72x512xf32, #tpu.memory_space<vmem>>, vector<72x512xf32>
    %cst = arith.constant dense<0.000000e+00> : vector<8x512xf32>
    %45 = tpu.matmul %43, %44, %cst {dimension_numbers = #tpu.dot_dimension_numbers<[1], [0], [0], [1], [0, 0, 1, 1], [], []>} : vector<8x72xf32>, vector<72x512xf32>, vector<8x512xf32> -> vector<8x512xf32>
    %cst_27 = arith.constant dense<0.000000e+00> : vector<8x2xf32>
    %46 = tpu.matmul %45, %0, %cst_27 {dimension_numbers = #tpu.dot_dimension_numbers<[1], [0], [0], [1], [0, 0, 1, 1], [], []>} : vector<8x512xf32>, vector<512x2xf32>, vector<8x2xf32> -> vector<8x2xf32>
    %47 = arith.mulf %45, %45 : vector<8x512xf32>
    %cst_28 = arith.constant dense<0.000000e+00> : vector<8x2xf32>
    %48 = tpu.matmul %47, %0, %cst_28 {dimension_numbers = #tpu.dot_dimension_numbers<[1], [0], [0], [1], [0, 0, 1, 1], [], []>} : vector<8x512xf32>, vector<512x2xf32>, vector<8x2xf32> -> vector<8x2xf32>
    %cst_29 = arith.constant dense<0.000000e+00> : vector<8xf32>
    %49 = vector.multi_reduction <add>, %46, %cst_29 [1] : vector<8x2xf32> to vector<8xf32>
    %50 = vector.shape_cast %49 : vector<8xf32> to vector<8x1xf32>
    %cst_30 = arith.constant dense<0.000000e+00> : vector<8xf32>
    %51 = vector.multi_reduction <add>, %48, %cst_30 [1] : vector<8x2xf32> to vector<8xf32>
    %52 = vector.shape_cast %51 : vector<8xf32> to vector<8x1xf32>
    %cst_31 = arith.constant 0.001953125 : f32
    %53 = vector.broadcast %cst_31 : f32 to vector<8x1xf32>
    %54 = arith.mulf %50, %53 : vector<8x1xf32>
    %cst_32 = arith.constant 0.001953125 : f32
    %55 = vector.broadcast %cst_32 : f32 to vector<8x1xf32>
    %56 = arith.mulf %52, %55 : vector<8x1xf32>
    %57 = arith.mulf %54, %54 : vector<8x1xf32>
    %58 = arith.subf %56, %57 : vector<8x1xf32>
    %cst_33 = arith.constant 0.000000e+00 : f32
    %59 = vector.broadcast %cst_33 : f32 to vector<8x1xf32>
    %60 = arith.maximumf %58, %59 : vector<8x1xf32>
    %c0_34 = arith.constant 0 : index
    %c0_35 = arith.constant 0 : index
    %61 = vector.load %arg4[%c0_34, %c0_35] : memref<8x1xf32, #tpu.memory_space<vmem>>, vector<8x1xf32>
    %62 = vector.broadcast %54 : vector<8x1xf32> to vector<8x512xf32>
    %63 = arith.subf %45, %62 : vector<8x512xf32>
    %cst_36 = arith.constant 9.99999974E-6 : f32
    %64 = vector.broadcast %cst_36 : f32 to vector<8x1xf32>
    %65 = arith.addf %60, %64 : vector<8x1xf32>
    %66 = math.rsqrt %65 : vector<8x1xf32>
    %67 = vector.broadcast %66 : vector<8x1xf32> to vector<8x512xf32>
    %68 = arith.mulf %63, %67 : vector<8x512xf32>
    %69 = vector.broadcast %61 : vector<8x1xf32> to vector<8x512xf32>
    %70 = arith.mulf %69, %68 : vector<8x512xf32>
    %c0_37 = arith.constant 0 : index
    %c0_38 = arith.constant 0 : index
    %71 = vector.load %arg5[%c0_37, %c0_38] : memref<8x1xf32, #tpu.memory_space<vmem>>, vector<8x1xf32>
    %72 = vector.broadcast %71 : vector<8x1xf32> to vector<8x512xf32>
    %73 = arith.addf %70, %72 : vector<8x512xf32>
    %cst_39 = arith.constant 0.000000e+00 : f32
    %74 = vector.broadcast %cst_39 : f32 to vector<8x512xf32>
    %75 = arith.maximumf %73, %74 : vector<8x512xf32>
    %c17_i32_40 = arith.constant 17 : i32
    %76 = tpu.dynamic_rotate %75 by %c17_i32_40 dim 1 : vector<8x512xf32>, i32 -> vector<8x512xf32>
    %c0_41 = arith.constant 0 : index
    %c0_42 = arith.constant 0 : index
    %77 = vector.load %arg1[%c0_41, %c0_42] : memref<9x512xf32, #tpu.memory_space<vmem>>, vector<1x512xf32>
    %78 = vector.broadcast %77 : vector<1x512xf32> to vector<8x512xf32>
    %79 = arith.mulf %76, %78 : vector<8x512xf32>
    %c0_43 = arith.constant 0 : index
    %c0_44 = arith.constant 0 : index
    %80 = vector.load %arg13[%c0_43, %c0_44] : memref<72x512xf32, #tpu.memory_space<vmem>>, vector<8x512xf32>
    tpu.vector_store %arg13[%c0_43, %c0_44], %79 {strides = array<i32>} : memref<72x512xf32, #tpu.memory_space<vmem>>, vector<8x512xf32>,
    %c16_i32_45 = arith.constant 16 : i32
    %81 = tpu.dynamic_rotate %75 by %c16_i32_45 dim 1 : vector<8x512xf32>, i32 -> vector<8x512xf32>
    %c1_46 = arith.constant 1 : index
    %c0_47 = arith.constant 0 : index
    %82 = vector.load %arg1[%c1_46, %c0_47] : memref<9x512xf32, #tpu.memory_space<vmem>>, vector<1x512xf32>
    %83 = vector.broadcast %82 : vector<1x512xf32> to vector<8x512xf32>
    %84 = arith.mulf %81, %83 : vector<8x512xf32>
    %c8_48 = arith.constant 8 : index
    %c0_49 = arith.constant 0 : index
    %85 = vector.load %arg13[%c8_48, %c0_49] : memref<72x512xf32, #tpu.memory_space<vmem>>, vector<8x512xf32>
    tpu.vector_store %arg13[%c8_48, %c0_49], %84 {strides = array<i32>} : memref<72x512xf32, #tpu.memory_space<vmem>>, vector<8x512xf32>,
    %c15_i32_50 = arith.constant 15 : i32
    %86 = tpu.dynamic_rotate %75 by %c15_i32_50 dim 1 : vector<8x512xf32>, i32 -> vector<8x512xf32>
    %c2_51 = arith.constant 2 : index
    %c0_52 = arith.constant 0 : index
    %87 = vector.load %arg1[%c2_51, %c0_52] : memref<9x512xf32, #tpu.memory_space<vmem>>, vector<1x512xf32>
    %88 = vector.broadcast %87 : vector<1x512xf32> to vector<8x512xf32>
    %89 = arith.mulf %86, %88 : vector<8x512xf32>
    %c16_53 = arith.constant 16 : index
    %c0_54 = arith.constant 0 : index
    %90 = vector.load %arg13[%c16_53, %c0_54] : memref<72x512xf32, #tpu.memory_space<vmem>>, vector<8x512xf32>
    tpu.vector_store %arg13[%c16_53, %c0_54], %89 {strides = array<i32>} : memref<72x512xf32, #tpu.memory_space<vmem>>, vector<8x512xf32>,
    %c1_i32_55 = arith.constant 1 : i32
    %91 = tpu.dynamic_rotate %75 by %c1_i32_55 dim 1 : vector<8x512xf32>, i32 -> vector<8x512xf32>
    %c3_56 = arith.constant 3 : index
    %c0_57 = arith.constant 0 : index
    %92 = vector.load %arg1[%c3_56, %c0_57] : memref<9x512xf32, #tpu.memory_space<vmem>>, vector<1x512xf32>
    %93 = vector.broadcast %92 : vector<1x512xf32> to vector<8x512xf32>
    %94 = arith.mulf %91, %93 : vector<8x512xf32>
    %c24_58 = arith.constant 24 : index
    %c0_59 = arith.constant 0 : index
    %95 = vector.load %arg13[%c24_58, %c0_59] : memref<72x512xf32, #tpu.memory_space<vmem>>, vector<8x512xf32>
    tpu.vector_store %arg13[%c24_58, %c0_59], %94 {strides = array<i32>} : memref<72x512xf32, #tpu.memory_space<vmem>>, vector<8x512xf32>,
    %c32_60 = arith.constant 32 : index
    %c0_61 = arith.constant 0 : index
    %96 = vector.load %arg13[%c32_60, %c0_61] : memref<72x512xf32, #tpu.memory_space<vmem>>, vector<8x512xf32>
    tpu.vector_store %arg13[%c32_60, %c0_61], %75 {strides = array<i32>} : memref<72x512xf32, #tpu.memory_space<vmem>>, vector<8x512xf32>,
    %c511_i32_62 = arith.constant 511 : i32
    %97 = tpu.dynamic_rotate %75 by %c511_i32_62 dim 1 : vector<8x512xf32>, i32 -> vector<8x512xf32>
    %c5_63 = arith.constant 5 : index
    %c0_64 = arith.constant 0 : index
    %98 = vector.load %arg1[%c5_63, %c0_64] : memref<9x512xf32, #tpu.memory_space<vmem>>, vector<1x512xf32>
    %99 = vector.broadcast %98 : vector<1x512xf32> to vector<8x512xf32>
    %100 = arith.mulf %97, %99 : vector<8x512xf32>
    %c40_65 = arith.constant 40 : index
    %c0_66 = arith.constant 0 : index
    %101 = vector.load %arg13[%c40_65, %c0_66] : memref<72x512xf32, #tpu.memory_space<vmem>>, vector<8x512xf32>
    tpu.vector_store %arg13[%c40_65, %c0_66], %100 {strides = array<i32>} : memref<72x512xf32, #tpu.memory_space<vmem>>, vector<8x512xf32>,
    %c497_i32_67 = arith.constant 497 : i32
    %102 = tpu.dynamic_rotate %75 by %c497_i32_67 dim 1 : vector<8x512xf32>, i32 -> vector<8x512xf32>
    %c6_68 = arith.constant 6 : index
    %c0_69 = arith.constant 0 : index
    %103 = vector.load %arg1[%c6_68, %c0_69] : memref<9x512xf32, #tpu.memory_space<vmem>>, vector<1x512xf32>
    %104 = vector.broadcast %103 : vector<1x512xf32> to vector<8x512xf32>
    %105 = arith.mulf %102, %104 : vector<8x512xf32>
    %c48_70 = arith.constant 48 : index
    %c0_71 = arith.constant 0 : index
    %106 = vector.load %arg13[%c48_70, %c0_71] : memref<72x512xf32, #tpu.memory_space<vmem>>, vector<8x512xf32>
    tpu.vector_store %arg13[%c48_70, %c0_71], %105 {strides = array<i32>} : memref<72x512xf32, #tpu.memory_space<vmem>>, vector<8x512xf32>,
    %c496_i32_72 = arith.constant 496 : i32
    %107 = tpu.dynamic_rotate %75 by %c496_i32_72 dim 1 : vector<8x512xf32>, i32 -> vector<8x512xf32>
    %c7_73 = arith.constant 7 : index
    %c0_74 = arith.constant 0 : index
    %108 = vector.load %arg1[%c7_73, %c0_74] : memref<9x512xf32, #tpu.memory_space<vmem>>, vector<1x512xf32>
    %109 = vector.broadcast %108 : vector<1x512xf32> to vector<8x512xf32>
    %110 = arith.mulf %107, %109 : vector<8x512xf32>
    %c56_75 = arith.constant 56 : index
    %c0_76 = arith.constant 0 : index
    %111 = vector.load %arg13[%c56_75, %c0_76] : memref<72x512xf32, #tpu.memory_space<vmem>>, vector<8x512xf32>
    tpu.vector_store %arg13[%c56_75, %c0_76], %110 {strides = array<i32>} : memref<72x512xf32, #tpu.memory_space<vmem>>, vector<8x512xf32>,
    %c495_i32_77 = arith.constant 495 : i32
    %112 = tpu.dynamic_rotate %75 by %c495_i32_77 dim 1 : vector<8x512xf32>, i32 -> vector<8x512xf32>
    %c8_78 = arith.constant 8 : index
    %c0_79 = arith.constant 0 : index
    %113 = vector.load %arg1[%c8_78, %c0_79] : memref<9x512xf32, #tpu.memory_space<vmem>>, vector<1x512xf32>
    %114 = vector.broadcast %113 : vector<1x512xf32> to vector<8x512xf32>
    %115 = arith.mulf %112, %114 : vector<8x512xf32>
    %c64_80 = arith.constant 64 : index
    %c0_81 = arith.constant 0 : index
    %116 = vector.load %arg13[%c64_80, %c0_81] : memref<72x512xf32, #tpu.memory_space<vmem>>, vector<8x512xf32>
    tpu.vector_store %arg13[%c64_80, %c0_81], %115 {strides = array<i32>} : memref<72x512xf32, #tpu.memory_space<vmem>>, vector<8x512xf32>,
    %c0_82 = arith.constant 0 : index
    %c0_83 = arith.constant 0 : index
    %117 = vector.load %arg6[%c0_82, %c0_83] : memref<32x72xf32, #tpu.memory_space<vmem>>, vector<32x72xf32>
    %c0_84 = arith.constant 0 : index
    %c0_85 = arith.constant 0 : index
    %118 = vector.load %arg13[%c0_84, %c0_85] : memref<72x512xf32, #tpu.memory_space<vmem>>, vector<72x512xf32>
    %cst_86 = arith.constant dense<0.000000e+00> : vector<32x512xf32>
    %119 = tpu.matmul %117, %118, %cst_86 {dimension_numbers = #tpu.dot_dimension_numbers<[1], [0], [0], [1], [0, 0, 1, 1], [], []>} : vector<32x72xf32>, vector<72x512xf32>, vector<32x512xf32> -> vector<32x512xf32>
    %cst_87 = arith.constant dense<0.000000e+00> : vector<32x2xf32>
    %120 = tpu.matmul %119, %0, %cst_87 {dimension_numbers = #tpu.dot_dimension_numbers<[1], [0], [0], [1], [0, 0, 1, 1], [], []>} : vector<32x512xf32>, vector<512x2xf32>, vector<32x2xf32> -> vector<32x2xf32>
    %121 = arith.mulf %119, %119 : vector<32x512xf32>
    %cst_88 = arith.constant dense<0.000000e+00> : vector<32x2xf32>
    %122 = tpu.matmul %121, %0, %cst_88 {dimension_numbers = #tpu.dot_dimension_numbers<[1], [0], [0], [1], [0, 0, 1, 1], [], []>} : vector<32x512xf32>, vector<512x2xf32>, vector<32x2xf32> -> vector<32x2xf32>
    %c0_89 = arith.constant 0 : index
    %c0_90 = arith.constant 0 : index
    %123 = vector.load %arg9[%c0_89, %c0_90] : memref<32x2xf32, #tpu.memory_space<vmem>>, vector<32x2xf32>
    %124 = arith.mulf %123, %120 : vector<32x2xf32>
    %cst_91 = arith.constant dense<0.000000e+00> : vector<32xf32>
    %125 = vector.multi_reduction <add>, %124, %cst_91 [1] : vector<32x2xf32> to vector<32xf32>
    %126 = vector.shape_cast %125 : vector<32xf32> to vector<32x1xf32>
    %cst_92 = arith.constant 0.001953125 : f32
    %127 = vector.broadcast %cst_92 : f32 to vector<32x1xf32>
    %128 = arith.mulf %126, %127 : vector<32x1xf32>
    %129 = arith.mulf %123, %123 : vector<32x2xf32>
    %130 = arith.mulf %129, %122 : vector<32x2xf32>
    %cst_93 = arith.constant dense<0.000000e+00> : vector<32xf32>
    %131 = vector.multi_reduction <add>, %130, %cst_93 [1] : vector<32x2xf32> to vector<32xf32>
    %132 = vector.shape_cast %131 : vector<32xf32> to vector<32x1xf32>
    %cst_94 = arith.constant 5.120000e+02 : f32
    %133 = vector.broadcast %cst_94 : f32 to vector<32x1xf32>
    %134 = arith.mulf %133, %128 : vector<32x1xf32>
    %135 = arith.mulf %134, %128 : vector<32x1xf32>
    %136 = arith.subf %132, %135 : vector<32x1xf32>
    %cst_95 = arith.constant 5.110000e+02 : f32
    %137 = vector.broadcast %cst_95 : f32 to vector<32x1xf32>
    %138 = arith.divf %136, %137 : vector<32x1xf32>
    %cst_96 = arith.constant 0.000000e+00 : f32
    %139 = vector.broadcast %cst_96 : f32 to vector<32x1xf32>
    %140 = arith.maximumf %138, %139 : vector<32x1xf32>
    %141 = math.sqrt %140 : vector<32x1xf32>
    %cst_97 = arith.constant 9.99999974E-6 : f32
    %142 = vector.broadcast %cst_97 : f32 to vector<32x1xf32>
    %143 = arith.addf %141, %142 : vector<32x1xf32>
    %144 = tpu.reciprocal %143 : vector<32x1xf32> -> vector<32x1xf32>
    %c0_98 = arith.constant 0 : index
    %c0_99 = arith.constant 0 : index
    %145 = vector.load %arg7[%c0_98, %c0_99] : memref<32x1xf32, #tpu.memory_space<vmem>>, vector<32x1xf32>
    %146 = vector.broadcast %128 : vector<32x1xf32> to vector<32x512xf32>
    %147 = arith.subf %119, %146 : vector<32x512xf32>
    %148 = vector.broadcast %144 : vector<32x1xf32> to vector<32x512xf32>
    %149 = arith.mulf %147, %148 : vector<32x512xf32>
    %150 = vector.broadcast %145 : vector<32x1xf32> to vector<32x512xf32>
    %151 = arith.mulf %150, %149 : vector<32x512xf32>
    %c0_100 = arith.constant 0 : index
    %c0_101 = arith.constant 0 : index
    %152 = vector.load %arg8[%c0_100, %c0_101] : memref<32x1xf32, #tpu.memory_space<vmem>>, vector<32x1xf32>
    %153 = vector.broadcast %152 : vector<32x1xf32> to vector<32x512xf32>
    %154 = arith.addf %151, %153 : vector<32x512xf32>
    %cst_102 = arith.constant 0.000000e+00 : f32
    %155 = vector.broadcast %cst_102 : f32 to vector<32x512xf32>
    %156 = arith.maximumf %154, %155 : vector<32x512xf32>
    %cst_103 = arith.constant dense<0.000000e+00> : vector<32x2xf32>
    %157 = tpu.matmul %156, %0, %cst_103 {dimension_numbers = #tpu.dot_dimension_numbers<[1], [0], [0], [1], [0, 0, 1, 1], [], []>} : vector<32x512xf32>, vector<512x2xf32>, vector<32x2xf32> -> vector<32x2xf32>
    %cst_104 = arith.constant 3.906250e-03 : f32
    %158 = vector.broadcast %cst_104 : f32 to vector<32x2xf32>
    %159 = arith.mulf %157, %158 : vector<32x2xf32>
    %c0_105 = arith.constant 0 : index
    %c0_106 = arith.constant 0 : index
    %160 = vector.load %arg10[%c0_105, %c0_106] : memref<20x32xf32, #tpu.memory_space<vmem>>, vector<20x32xf32>
    %cst_107 = arith.constant dense<0.000000e+00> : vector<20x2xf32>
    %161 = tpu.matmul %160, %159, %cst_107 {dimension_numbers = #tpu.dot_dimension_numbers<[1], [0], [0], [1], [0, 0, 1, 1], [], []>} : vector<20x32xf32>, vector<32x2xf32>, vector<20x2xf32> -> vector<20x2xf32>
    %c0_108 = arith.constant 0 : index
    %c0_109 = arith.constant 0 : index
    %162 = vector.load %arg11[%c0_108, %c0_109] : memref<20x1xf32, #tpu.memory_space<vmem>>, vector<20x1xf32>
    %163 = vector.broadcast %162 : vector<20x1xf32> to vector<20x2xf32>
    %164 = arith.addf %161, %163 : vector<20x2xf32>
    %c0_110 = arith.constant 0 : index
    %c0_111 = arith.constant 0 : index
    %165 = vector.load %arg12[%c0_110, %c0_111] : memref<20x2xf32, #tpu.memory_space<vmem>>, vector<20x2xf32>
    tpu.vector_store %arg12[%c0_110, %c0_111], %164 {strides = array<i32>} : memref<20x2xf32, #tpu.memory_space<vmem>>, vector<20x2xf32>,
    return
  }
}

</mosaic_0001>

<bundles_post_ra>
// kernel: tpu_custom_call.1
= control target key start
LH: loop header
LB: loop body
LE: loop exit
PB: predicated region body
PF: predicated region fallthrough
CT: control target
= control target key end

     0   :  { %s3308_s25 = smov 17   ;;  %s3309_s30 = smov 16   ;;  %v4530_v4 = vmov 0.0   ;;  %v117_v5 = vlaneseq  ;;  %vm503_vm8 = vcmask 588800   ;;  %vm933_vm9 = vcmask 15360   ;;  %s4517_s0 = inlined_call_operand.vmem [shape: f32[8,512], index: 0, kind: input, shape index: {}]   ;;  %s4518_s1 = inlined_call_operand.vmem [shape: f32[9,512], index: 1, kind: input, shape index: {}]   ;;  %s4519_s2 = inlined_call_operand.vmem [shape: f32[512,2], index: 2, kind: input, shape index: {}]   ;;  %s4520_s3 = inlined_call_operand.vmem [shape: f32[8,72], index: 3, kind: input, shape index: {}]   ;;  %s4521_s4 = inlined_call_operand.vmem [shape: f32[8,1], index: 4, kind: input, shape index: {}]   ;;  %s4522_s5 = inlined_call_operand.vmem [shape: f32[8,1], index: 5, kind: input, shape index: {}]   ;;  %s4523_s6 = inlined_call_operand.vmem [shape: f32[32,72], index: 6, kind: input, shape index: {}]   ;;  %s4524_s9 = inlined_call_operand.vmem [shape: f32[32,2], index: 9, kind: input, shape index: {}]   ;;  %s4525_s7 = inlined_call_operand.vmem [shape: f32[32,1], index: 7, kind: input, shape index: {}]   ;;  %s4526_s8 = inlined_call_operand.vmem [shape: f32[32,1], index: 8, kind: input, shape index: {}]   ;;  %s4527_s11 = inlined_call_operand.vmem [shape: f32[20,1], index: 11, kind: input, shape index: {}]   ;;  %s4528_s10 = inlined_call_operand.vmem [shape: f32[20,32], index: 10, kind: input, shape index: {}]   ;;  %s4529_s12 = inlined_call_operand.vmem [shape: f32[20,2], index: 12, kind: output, shape index: {}]  }
   0x1   :  { %v3388_v0 = vld [vmem:[%s4517_s0 + $0x10] sm:$0xff]  ;;  %v3393_v1 = vld [vmem:[%s4517_s0] sm:$0xff]  ;;  %v3402_v2 = vld [vmem:[%s4517_s0 + $0x18] sm:$0xff]  ;;  %s3311_s13 = smov 1   ;;  %s3312_s14 = smov 127   ;;  %571 = vmatprep.mubr.f32.mxu0 %v4530_v4  ;;  %642 = vmatprep.mubr.f32.mxu1 %v4530_v4 }
   0x2   :  { %113 = vrot.lane.b32.xlu1 %v3388_v0, %s3308_s25  ;;  %109 = vrot.lane.b32.xlu0 %v3393_v1, %s3308_s25  ;;  %v3407_v3 = vld [vmem:[%s4517_s0 + $0x8] sm:$0xff]  ;;  %s3310_s0 = smov 15   ;;  %s3313_s15 = smov 113   ;;  %v127_v6 = vshrl.u32 %v117_v5, 7  ;;  %v3471_v9 = vand.u32 127, %v117_v5 }
   0x3   :  { %s3314_s16 = smov 112   ;;  %s3316_s17 = smov 111   ;;  %v124_v11 = vld [vmem:[%s4518_s1] ss:$8 sm:$0xf] }
   0x4   :  { %v3473_v10 = vsub.s32 1, %v127_v6  ;;  %v2427_v12 = vld [vmem:[%s4518_s1 + $0x1] ss:$8 sm:$0xf]  ;;  %vm119_vm0 = vcmp.lt.s32.totalorder %v3471_v9, 17  ;;  %v3482_v13 = vsub.s32 0, %v127_v6 }
   0x5   :  { %v3484_v14 = vsub.s32 2, %v127_v6  ;;  %v3486_v17 = vsub.s32 3, %v127_v6  ;;  %vm162_vm1 = vcmp.lt.s32.totalorder %v3471_v9, 16  ;;  %v2428_v52 = vld [vmem:[%s4518_s1 + $0x2] ss:$8 sm:$0xf] }
   0x6   :  { %115 = vrot.lane.b32.xlu1 %v3402_v2, %s3308_s25  ;;  %111 = vrot.lane.b32.xlu0 %v3407_v3, %s3308_s25  ;;  %v133_v18 = vrot.slane %v124_v11, %v3473_v10  ;;  %v177_v19 = vrot.slane %v2427_v12, %v3473_v10  ;;  %v129_v21 = vrot.slane %v124_v11, %v3482_v13  ;;  %v2429_v53 = vld [vmem:[%s4518_s1 + $0x3] ss:$8 sm:$0xf]  ;;  %vm206_vm2 = vcmp.lt.s32.totalorder %v3471_v9, 15 }
   0x7   :  { %v137_v22 = vrot.slane %v124_v11, %v3484_v14  ;;  %v173_v25 = vrot.slane %v2427_v12, %v3482_v13  ;;  %v181_v28 = vrot.slane %v2427_v12, %v3484_v14  ;;  %v141_v29 = vrot.slane %v124_v11, %v3486_v17 }
   0x8   :  { %v185_v33 = vrot.slane %v2427_v12, %v3486_v17  ;;  %v221_v56 = vrot.slane %v2428_v52, %v3473_v10  ;;  %vm250_vm3 = vcmp.lt.s32.totalorder %v3471_v9, 1  ;;  %v265_v57 = vrot.slane %v2429_v53, %v3473_v10 }
   0x9   :  { %v217_v59 = vrot.slane %v2428_v52, %v3482_v13  ;;  %v225_v60 = vrot.slane %v2428_v52, %v3484_v14  ;;  %v229_v61 = vrot.slane %v2428_v52, %v3486_v17  ;;  %vm298_vm4 = vcmp.lt.s32.totalorder %v3471_v9, 127 }
   0xa   :  { %156 = vrot.lane.b32.xlu1 %v3407_v3, %s3309_s30  ;;  %154 = vrot.lane.b32.xlu0 %v3393_v1, %s3309_s30  ;;  %vm386_vm5 = vcmp.lt.s32.totalorder %v3471_v9, 112  ;;  %vm342_vm6 = vcmp.lt.s32.totalorder %v3471_v9, 113  ;;  %vm430_vm7 = vcmp.lt.s32.totalorder %v3471_v9, 111  ;;  %v1321_v9 = vld [vmem:[%s4523_s6 + $0x10] sm:$0xff] }
   0xe   :  { %160 = vrot.lane.b32.xlu1 %v3402_v2, %s3309_s30  ;;  %158 = vrot.lane.b32.xlu0 %v3388_v0, %s3309_s30 }
  0x12   :  { %200 = vrot.lane.b32.xlu1 %v3407_v3, %s3310_s0  ;;  %198 = vrot.lane.b32.xlu0 %v3393_v1, %s3310_s0 }
  0x16   :  { %204 = vrot.lane.b32.xlu1 %v3402_v2, %s3310_s0  ;;  %202 = vrot.lane.b32.xlu0 %v3388_v0, %s3310_s0 }
  0x1a   :  { %244 = vrot.lane.b32.xlu1 %v3407_v3, %s3311_s13  ;;  %242 = vrot.lane.b32.xlu0 %v3393_v1, %s3311_s13 }
  0x1e   :  { %248 = vrot.lane.b32.xlu1 %v3402_v2, %s3311_s13  ;;  %246 = vrot.lane.b32.xlu0 %v3388_v0, %s3311_s13 }
  0x22   :  { %292 = vrot.lane.b32.xlu1 %v3407_v3, %s3312_s14  ;;  %290 = vrot.lane.b32.xlu0 %v3393_v1, %s3312_s14 }
  0x26   :  { %296 = vrot.lane.b32.xlu1 %v3402_v2, %s3312_s14  ;;  %294 = vrot.lane.b32.xlu0 %v3388_v0, %s3312_s14 }
  0x2a   :  { %336 = vrot.lane.b32.xlu1 %v3407_v3, %s3313_s15  ;;  %334 = vrot.lane.b32.xlu0 %v3393_v1, %s3313_s15 }
  0x2e   :  { %340 = vrot.lane.b32.xlu1 %v3402_v2, %s3313_s15  ;;  %338 = vrot.lane.b32.xlu0 %v3388_v0, %s3313_s15 }
  0x32   :  { %380 = vrot.lane.b32.xlu1 %v3407_v3, %s3314_s16  ;;  %378 = vrot.lane.b32.xlu0 %v3393_v1, %s3314_s16 }
  0x36   :  { %384 = vrot.lane.b32.xlu1 %v3402_v2, %s3314_s16  ;;  %382 = vrot.lane.b32.xlu0 %v3388_v0, %s3314_s16 }
  0x3a   :  { %424 = vrot.lane.b32.xlu1 %v3407_v3, %s3316_s17  ;;  %422 = vrot.lane.b32.xlu0 %v3393_v1, %s3316_s17 }
  0x3e   :  { %428 = vrot.lane.b32.xlu1 %v3402_v2, %s3316_s17  ;;  %426 = vrot.lane.b32.xlu0 %v3388_v0, %s3316_s17 }
  0x74   :  { %v114_v7 = vpop.permute.xlu1 %113  ;;  %v110_v8 = vpop.permute.xlu0 %109 }
  0x78   :  { %v116_v15 = vpop.permute.xlu1 %115  ;;  %v112_v16 = vpop.permute.xlu0 %111 }
  0x79   :  { %v122_v20 = vsel %vm119_vm0, %v110_v8, %v112_v16  ;;  %v123_v26 = vsel %vm119_vm0, %v116_v15, %v110_v8  ;;  %v121_v30 = vsel %vm119_vm0, %v112_v16, %v114_v7  ;;  %v120_v34 = vsel %vm119_vm0, %v114_v7, %v116_v15 }
  0x7a   :  { %v147_v31 = vmul.f32 %v133_v18, %v122_v20  ;;  %v146_v35 = vmul.f32 %v129_v21, %v123_v26  ;;  %v148_v39 = vmul.f32 %v137_v22, %v121_v30  ;;  %v149_v45 = vmul.f32 %v141_v29, %v120_v34 }
  0x7b   :  { %v261_v7 = vrot.slane %v2429_v53, %v3482_v13  ;;  %v269_v8 = vrot.slane %v2429_v53, %v3484_v14  ;;  %v273_v16 = vrot.slane %v2429_v53, %v3486_v17 }
  0x7c   :  { %v157_v23 = vpop.permute.xlu1 %156  ;;  %v155_v24 = vpop.permute.xlu0 %154 }
  0x7d   :  { %v165_v27 = vsel %vm162_vm1, %v155_v24, %v157_v23 }
  0x7e   :  { %v191_v32 = vmul.f32 %v177_v19, %v165_v27 }
  0x80   :  { %v161_v36 = vpop.permute.xlu1 %160  ;;  %v159_v37 = vpop.permute.xlu0 %158  ;;  %v2882_v38 = vpack.c.bf16 %v191_v32, %v147_v31  ;;  %v2430_v31 = vld [vmem:[%s4518_s1 + $0x5] ss:$8 sm:$0xf] }
  0x81   :  { %v166_v40 = vsel %vm162_vm1, %v161_v36, %v155_v24  ;;  %v163_v41 = vsel %vm162_vm1, %v159_v37, %v161_v36  ;;  %v164_v42 = vsel %vm162_vm1, %v157_v23, %v159_v37  ;;  %v309_v37 = vrot.slane %v2430_v31, %v3482_v13 }
  0x82   :  { %v190_v43 = vmul.f32 %v173_v25, %v166_v40  ;;  %v192_v44 = vmul.f32 %v181_v28, %v164_v42  ;;  %2883 = vmatprep.subr.bf16.mxu0 %v2882_v38  ;;  %v193_v46 = vmul.f32 %v185_v33, %v163_v41  ;;  %v321_v38 = vrot.slane %v2430_v31, %v3486_v17 }
  0x83   :  { %v313_v40 = vrot.slane %v2430_v31, %v3473_v10  ;;  %v317_v41 = vrot.slane %v2430_v31, %v3484_v14 }
  0x84   :  { %v201_v47 = vpop.permute.xlu1 %200  ;;  %v199_v48 = vpop.permute.xlu0 %198  ;;  %v2884_v49 = vpack.c.bf16 %v190_v43, %v146_v35  ;;  %v2898_v50 = vpack.c.bf16 %v193_v46, %v149_v45  ;;  %v2900_v51 = vpack.c.bf16 %v192_v44, %v148_v39 }
  0x85   :  { %v209_v58 = vsel %vm206_vm2, %v199_v48, %v201_v47 }
  0x86   :  { %2885 = vmatpush1.bf16.msra.mxu0 %v2884_v49  ;;  %2899 = vmatprep.subr.bf16.mxu1 %v2898_v50  ;;  %v235_v11 = vmul.f32 %v221_v56, %v209_v58 }
  0x87   :  { %2901 = vmatpush1.bf16.msra.mxu1 %v2900_v51 }
  0x88   :  { %v205_v54 = vpop.permute.xlu1 %204  ;;  %v203_v55 = vpop.permute.xlu0 %202 }
  0x89   :  { %v210_v5 = vsel %vm206_vm2, %v205_v54, %v199_v48  ;;  %v208_v12 = vsel %vm206_vm2, %v201_v47, %v203_v55  ;;  %v207_v18 = vsel %vm206_vm2, %v203_v55, %v205_v54 }
  0x8a   :  { %v234_v19 = vmul.f32 %v217_v59, %v210_v5  ;;  %v236_v23 = vmul.f32 %v225_v60, %v208_v12  ;;  %v237_v27 = vmul.f32 %v229_v61, %v207_v18  ;;  %v2432_v59 = vld [vmem:[%s4518_s1 + $0x7] ss:$8 sm:$0xf] }
  0x8b   :  { %v397_v5 = vrot.slane %v2432_v59, %v3482_v13 }
  0x8c   :  { %v245_v62 = vpop.permute.xlu1 %244  ;;  %v243_v63 = vpop.permute.xlu0 %242 }
  0x8d   :  { %v253_v6 = vsel %vm250_vm3, %v243_v63, %v245_v62 }
  0x8e   :  { %v279_v15 = vmul.f32 %v265_v57, %v253_v6 }
  0x90   :  { %v249_v20 = vpop.permute.xlu1 %248  ;;  %v247_v21 = vpop.permute.xlu0 %246  ;;  %v2886_v22 = vpack.c.bf16 %v279_v15, %v235_v11  ;;  %v405_v11 = vrot.slane %v2432_v59, %v3484_v14 }
  0x91   :  { %v254_v24 = vsel %vm250_vm3, %v249_v20, %v243_v63  ;;  %v251_v25 = vsel %vm250_vm3, %v247_v21, %v249_v20  ;;  %v252_v26 = vsel %vm250_vm3, %v245_v62, %v247_v21 }
  0x92   :  { %v278_v28 = vmul.f32 %v261_v7, %v254_v24  ;;  %v280_v29 = vmul.f32 %v269_v8, %v252_v26  ;;  %v281_v30 = vmul.f32 %v273_v16, %v251_v25  ;;  %2887 = vmatprep.subr.bf16.mxu0 %v2886_v22  ;;  %v409_v7 = vrot.slane %v2432_v59, %v3486_v17 }
  0x93   :  { %v401_v8 = vrot.slane %v2432_v59, %v3473_v10 }
  0x94   :  { %v293_v32 = vpop.permute.xlu1 %292  ;;  %v291_v33 = vpop.permute.xlu0 %290  ;;  %v2888_v34 = vpack.c.bf16 %v278_v28, %v234_v19  ;;  %v2902_v35 = vpack.c.bf16 %v281_v30, %v237_v27  ;;  %v2904_v36 = vpack.c.bf16 %v280_v29, %v236_v23 }
  0x95   :  { %v301_v39 = vsel %vm298_vm4, %v291_v33, %v293_v32 }
  0x96   :  { %2889 = vmatpush1.bf16.msra.mxu0 %v2888_v34  ;;  %2903 = vmatprep.subr.bf16.mxu1 %v2902_v35  ;;  %v326_v44 = vmul.f32 %v309_v37, %v301_v39 }
  0x97   :  { %2905 = vmatpush1.bf16.msra.mxu1 %v2904_v36 }
  0x98   :  { %v297_v42 = vpop.permute.xlu1 %296  ;;  %v295_v43 = vpop.permute.xlu0 %294  ;;  %v2892_v56 = vpack.c.bf16 %v326_v44, %v3393_v1  ;;  %v89_v44 = vld [vmem:[%s4519_s2 + $0x180] sm:$0xff] }
  0x99   :  { %v302_v45 = vsel %vm298_vm4, %v297_v42, %v291_v33  ;;  %v299_v46 = vsel %vm298_vm4, %v295_v43, %v297_v42  ;;  %v300_v47 = vsel %vm298_vm4, %v293_v32, %v295_v43  ;;  %v2433_v32 = vld [vmem:[%s4518_s1 + $0x20] ss:$8 sm:$0xf] }
  0x9a   :  { %v329_v48 = vmul.f32 %v321_v38, %v302_v45  ;;  %v327_v49 = vmul.f32 %v313_v40, %v300_v47  ;;  %v328_v50 = vmul.f32 %v317_v41, %v299_v46  ;;  %v453_v38 = vrot.slane %v2433_v32, %v3486_v17  ;;  %v57_v42 = vld [vmem:[%s4519_s2 + $0x80] sm:$0xff]  ;;  %v58_v43 = vld [vmem:[%s4519_s2 + $0x88] sm:$0xff] }
  0x9b   :  { %v445_v39 = vrot.slane %v2433_v32, %v3473_v10  ;;  %v449_v40 = vrot.slane %v2433_v32, %v3484_v14  ;;  %v441_v41 = vrot.slane %v2433_v32, %v3482_v13  ;;  %v96_v32 = vld [vmem:[%s4519_s2 + $0x1b8] sm:$0xff] }
  0x9c   :  { %v337_v51 = vpop.permute.xlu1 %336  ;;  %v335_v52 = vpop.permute.xlu0 %334  ;;  %v2890_v53 = vpack.c.bf16 %v327_v49, %v3407_v3  ;;  %v2906_v54 = vpack.c.bf16 %v329_v48, %v3402_v2  ;;  %v2908_v55 = vpack.c.bf16 %v328_v50, %v3388_v0  ;;  %v2431_v3 = vld [vmem:[%s4518_s1 + $0x6] ss:$8 sm:$0xf] }
  0x9d   :  { %v365_v0 = vrot.slane %v2431_v3, %v3486_v17  ;;  %v357_v1 = vrot.slane %v2431_v3, %v3473_v10  ;;  %v361_v62 = vrot.slane %v2431_v3, %v3484_v14  ;;  %v353_v12 = vrot.slane %v2431_v3, %v3482_v13  ;;  %v90_v48 = vld [vmem:[%s4519_s2 + $0x188] sm:$0xff]  ;;  %v41_v49 = vld [vmem:[%s4519_s2] sm:$0xff]  ;;  %v60_v3 = vld [vmem:[%s4519_s2 + $0x98] sm:$0xff] }
  0x9e   :  { %2891 = vmatprep.subr.bf16.mxu0 %v2890_v53  ;;  %2907 = vmatprep.subr.bf16.mxu1 %v2906_v54  ;;  %v345_v16 = vsel %vm342_vm6, %v335_v52, %v337_v51  ;;  %v42_v50 = vld [vmem:[%s4519_s2 + $0x8] sm:$0xff]  ;;  %v73_v54 = vld [vmem:[%s4519_s2 + $0x100] sm:$0xff] }
  0x9f   :  { %2893 = vmatpush1.bf16.msra.mxu0 %v2892_v56  ;;  %2909 = vmatpush1.bf16.msra.mxu1 %v2908_v55  ;;  %v370_v30 = vmul.f32 %v353_v12, %v345_v16  ;;  %v74_v55 = vld [vmem:[%s4519_s2 + $0x108] sm:$0xff]  ;;  %v59_v56 = vld [vmem:[%s4519_s2 + $0x90] sm:$0xff]  ;;  %v61_v16 = vld [vmem:[%s4519_s2 + $0xa0] sm:$0xff] }
  0xa0   :  { %v341_v57 = vpop.permute.xlu1 %340  ;;  %v339_v58 = vpop.permute.xlu0 %338  ;;  %v75_v12 = vld [vmem:[%s4519_s2 + $0x110] sm:$0xff] }
  0xa1   :  { %v346_v61 = vsel %vm342_vm6, %v341_v57, %v335_v52  ;;  %v344_v63 = vsel %vm342_vm6, %v337_v51, %v339_v58  ;;  %v343_v15 = vsel %vm342_vm6, %v339_v58, %v341_v57 }
  0xa2   :  { %v373_v18 = vmul.f32 %v365_v0, %v346_v61  ;;  %v371_v19 = vmul.f32 %v357_v1, %v344_v63  ;;  %v372_v26 = vmul.f32 %v361_v62, %v343_v15  ;;  %v91_v0 = vld [vmem:[%s4519_s2 + $0x190] sm:$0xff]  ;;  %v92_v1 = vld [vmem:[%s4519_s2 + $0x198] sm:$0xff]  ;;  %v3652_v61 = vpack.c.bf16 %v58_v43, %v57_v42  ;;  %v66_v42 = vld [vmem:[%s4519_s2 + $0xc8] sm:$0xff] }
  0xa3   :  { %v3654_v62 = vpack.c.bf16 %v90_v48, %v89_v44  ;;  %v3656_v63 = vpack.c.bf16 %v42_v50, %v41_v49  ;;  %v76_v15 = vld [vmem:[%s4519_s2 + $0x118] sm:$0xff]  ;;  %v97_v43 = vld [vmem:[%s4519_s2 + $0x1c0] sm:$0xff]  ;;  %v98_v44 = vld [vmem:[%s4519_s2 + $0x1c8] sm:$0xff] }
  0xa4   :  { %v381_v2 = vpop.permute.xlu1 %380  ;;  %v379_v60 = vpop.permute.xlu0 %378  ;;  %v50_v48 = vld [vmem:[%s4519_s2 + $0x48] sm:$0xff]  ;;  %v3780_v50 = vpack.c.bf16 %v98_v44, %v97_v43  ;;  %v87_v43 = vld [vmem:[%s4519_s2 + $0x170] sm:$0xff]  ;;  %v88_v44 = vld [vmem:[%s4519_s2 + $0x178] sm:$0xff] }
  0xa5   :  { %v389_v6 = vsel %vm386_vm5, %v379_v60, %v381_v2 }
  0xa6   :  { %v414_v22 = vmul.f32 %v397_v5, %v389_v6  ;;  %v3658_v5 = vpack.c.bf16 %v74_v55, %v73_v54  ;;  %v43_v6 = vld [vmem:[%s4519_s2 + $0x10] sm:$0xff]  ;;  %v68_v54 = vld [vmem:[%s4519_s2 + $0xd8] sm:$0xff] }
  0xa7   :  { %v99_v55 = vld [vmem:[%s4519_s2 + $0x1d0] sm:$0xff] }
  0xa8   :  { %v385_v20 = vpop.permute.xlu1 %384  ;;  %v383_v21 = vpop.permute.xlu0 %382  ;;  %v2896_v37 = vpack.c.bf16 %v414_v22, %v370_v30  ;;  %v3696_v22 = vpack.c.bf16 %v76_v15, %v75_v12  ;;  %v64_v30 = vld [vmem:[%s4519_s2 + $0xb8] sm:$0xff]  ;;  %v101_v12 = vld [vmem:[%s4519_s2 + $0x1e0] sm:$0xff]  ;;  %v102_v15 = vld [vmem:[%s4519_s2 + $0x1e8] sm:$0xff] }
  0xa9   :  { %v390_v23 = vsel %vm386_vm5, %v385_v20, %v379_v60  ;;  %v387_v24 = vsel %vm386_vm5, %v383_v21, %v385_v20  ;;  %v388_v25 = vsel %vm386_vm5, %v381_v2, %v383_v21  ;;  %v466_v60 = vld [vmem:[%s4520_s3] sm:$0xff]  ;;  %v94_v20 = vld [vmem:[%s4519_s2 + $0x1a8] sm:$0xff] }
  0xaa   :  { %v417_v27 = vmul.f32 %v409_v7, %v390_v23  ;;  %v415_v28 = vmul.f32 %v401_v8, %v388_v25  ;;  %v416_v29 = vmul.f32 %v405_v11, %v387_v24  ;;  %v44_v7 = vld [vmem:[%s4519_s2 + $0x18] sm:$0xff]  ;;  %v3666_v8 = vpack.c.bf16 %v60_v3, %v59_v56  ;;  %v45_v23 = vld [vmem:[%s4519_s2 + $0x20] sm:$0xff]  ;;  %v46_v24 = vld [vmem:[%s4519_s2 + $0x28] sm:$0xff] }
  0xab   :  { %v3668_v11 = vpack.c.bf16 %v92_v1, %v91_v0  ;;  %v3694_v21 = vpack.c.bf16 %v44_v7, %v43_v6  ;;  %v100_v56 = vld [vmem:[%s4519_s2 + $0x1d8] sm:$0xff]  ;;  %v69_v6 = vld [vmem:[%s4519_s2 + $0xe0] sm:$0xff]  ;;  %v70_v7 = vld [vmem:[%s4519_s2 + $0xe8] sm:$0xff] }
  0xac   :  { %v425_v31 = vpop.permute.xlu1 %424  ;;  %v423_v33 = vpop.permute.xlu0 %422  ;;  %v2894_v34 = vpack.c.bf16 %v415_v28, %v371_v19  ;;  %v2910_v35 = vpack.c.bf16 %v417_v27, %v373_v18  ;;  %v2912_v36 = vpack.c.bf16 %v416_v29, %v372_v26  ;;  %v62_v18 = vld [vmem:[%s4519_s2 + $0xa8] sm:$0xff]  ;;  %v93_v19 = vld [vmem:[%s4519_s2 + $0x1a0] sm:$0xff]  ;;  %v63_v29 = vld [vmem:[%s4519_s2 + $0xb0] sm:$0xff]  ;;  %v3816_v1 = vpack.c.bf16 %v100_v56, %v99_v55 }
  0xad   :  { %v433_v45 = vsel %vm430_vm7, %v423_v33, %v425_v31  ;;  %v3706_v25 = vpack.c.bf16 %v62_v18, %v61_v16  ;;  %v3708_v26 = vpack.c.bf16 %v94_v20, %v93_v19  ;;  %v77_v27 = vld [vmem:[%s4519_s2 + $0x120] sm:$0xff]  ;;  %v78_v28 = vld [vmem:[%s4519_s2 + $0x128] sm:$0xff]  ;;  %v52_v3 = vld [vmem:[%s4519_s2 + $0x58] sm:$0xff] }
  0xae   :  { %2895 = vmatprep.subr.bf16.mxu0 %v2894_v34  ;;  %2911 = vmatprep.subr.bf16.mxu1 %v2910_v35  ;;  %v458_v2 = vmul.f32 %v441_v41, %v433_v45  ;;  %v3732_v34 = vpack.c.bf16 %v78_v28, %v77_v27  ;;  %v47_v35 = vld [vmem:[%s4519_s2 + $0x30] sm:$0xff]  ;;  %v65_v41 = vld [vmem:[%s4519_s2 + $0xc0] sm:$0xff]  ;;  %4552 = vst [vmem:[#allocation3_spill] sm:$0xff] %v3816_v1  ;;  %v54_v20 = vld [vmem:[%s4519_s2 + $0x68] sm:$0xff] }
  0xaf   :  { %2897 = vmatpush1.bf16.msra.mxu0 %v2896_v37  ;;  %2913 = vmatpush1.bf16.msra.mxu1 %v2912_v36  ;;  %v48_v36 = vld [vmem:[%s4519_s2 + $0x38] sm:$0xff]  ;;  %v3742_v37 = vpack.c.bf16 %v64_v30, %v63_v29  ;;  %v3778_v49 = vpack.c.bf16 %v66_v42, %v65_v41  ;;  %v53_v19 = vld [vmem:[%s4519_s2 + $0x60] sm:$0xff]  ;;  %v86_v28 = vld [vmem:[%s4519_s2 + $0x168] sm:$0xff] }
  0xb0   :  { %v429_v46 = vpop.permute.xlu1 %428  ;;  %v427_v47 = vpop.permute.xlu0 %426  ;;  %v3766_v45 = vpack.c.bf16 %v48_v36, %v47_v35  ;;  %v85_v27 = vld [vmem:[%s4519_s2 + $0x160] sm:$0xff]  ;;  %v71_v29 = vld [vmem:[%s4519_s2 + $0xf0] sm:$0xff]  ;;  %v72_v30 = vld [vmem:[%s4519_s2 + $0xf8] sm:$0xff]  ;;  %v3874_v35 = vpack.c.bf16 %v54_v20, %v53_v19 }
  0xb1   :  { %v434_v51 = vsel %vm430_vm7, %v429_v46, %v423_v33  ;;  %v431_v52 = vsel %vm430_vm7, %v427_v47, %v429_v46  ;;  %v432_v53 = vsel %vm430_vm7, %v425_v31, %v427_v47  ;;  %v95_v31 = vld [vmem:[%s4519_s2 + $0x1b0] sm:$0xff]  ;;  %v3730_v33 = vpack.c.bf16 %v46_v24, %v45_v23  ;;  %v49_v47 = vld [vmem:[%s4519_s2 + $0x40] sm:$0xff]  ;;  %v56_v42 = vld [vmem:[%s4519_s2 + $0x78] sm:$0xff] }
  0xb2   :  { %v461_v57 = vmul.f32 %v453_v38, %v434_v51  ;;  %v459_v58 = vmul.f32 %v445_v39, %v432_v53  ;;  %v460_v59 = vmul.f32 %v449_v40, %v431_v52  ;;  %v3744_v38 = vpack.c.bf16 %v96_v32, %v95_v31  ;;  %v79_v39 = vld [vmem:[%s4519_s2 + $0x130] sm:$0xff]  ;;  %v80_v40 = vld [vmem:[%s4519_s2 + $0x138] sm:$0xff]  ;;  %v81_v51 = vld [vmem:[%s4519_s2 + $0x140] sm:$0xff]  ;;  %4556 = vst [vmem:[#allocation7_spill] sm:$0xff] %v3874_v35 }
  0xb3   :  { %v3768_v46 = vpack.c.bf16 %v80_v40, %v79_v39  ;;  %v82_v52 = vld [vmem:[%s4519_s2 + $0x148] sm:$0xff]  ;;  %v67_v53 = vld [vmem:[%s4519_s2 + $0xd0] sm:$0xff]  ;;  %v3850_v23 = vpack.c.bf16 %v70_v7, %v69_v6  ;;  %v3852_v24 = vpack.c.bf16 %v102_v15, %v101_v12  ;;  %v104_v32 = vld [vmem:[%s4519_s2 + $0x1f8] sm:$0xff]  ;;  %v3876_v36 = vpack.c.bf16 %v86_v28, %v85_v27 }
  0xb4   :  { %523 = vmatprep.subr.mxu0 %v459_v58  ;;  %594 = vmatprep.subr.mxu1 %v461_v57  ;;  %v3802_v57 = vpack.c.bf16 %v50_v48, %v49_v47  ;;  %v3804_v58 = vpack.c.bf16 %v82_v52, %v81_v51  ;;  %v3814_v0 = vpack.c.bf16 %v68_v54, %v67_v53  ;;  %v103_v31 = vld [vmem:[%s4519_s2 + $0x1f0] sm:$0xff]  ;;  %v945_v28 = vld [vmem:[%s4521_s4] sm:$0xff] }
  0xb5   :  { %524 = vmatpush1.msra.mxu0 %v458_v2  ;;  %595 = vmatpush1.msra.mxu1 %v460_v59  ;;  %v51_v59 = vld [vmem:[%s4519_s2 + $0x50] sm:$0xff]  ;;  %4554 = vst [vmem:[#allocation5_spill] sm:$0xff] %v3850_v23  ;;  %4555 = vst [vmem:[#allocation6_spill] sm:$0xff] %v3852_v24  ;;  %v3883_v40 = vpack.c.bf16 %v72_v30, %v71_v29  ;;  %v3885_v41 = vpack.c.bf16 %v104_v32, %v103_v31 }
  0xb6   :  { %2434 = vmatmul.mubr.msk.f32.vlgmr.msra.gmra.mrb[0].mxu0 %vm503_vm8, %v466_v60  ;;  %2435 = vmatmul.mubr.msk.f32.vlgmr.msra.gmra.mrb[0].mxu1 %vm503_vm8, %v466_v60  ;;  %v83_v2 = vld [vmem:[%s4519_s2 + $0x150] sm:$0xff]  ;;  %v84_v60 = vld [vmem:[%s4519_s2 + $0x158] sm:$0xff]  ;;  %v3838_v16 = vpack.c.bf16 %v52_v3, %v51_v59  ;;  %4557 = vst [vmem:[#allocation8_spill] sm:$0xff] %v3876_v36  ;;  %v3900_v48 = vpack.c.bf16 %v88_v44, %v87_v43 }
  0xb7   :  { %2915 = vmatprep.subr.bf16.mxu0 %v3652_v61  ;;  %2947 = vmatprep.subr.bf16.mxu1 %v3654_v62  ;;  %v3840_v18 = vpack.c.bf16 %v84_v60, %v83_v2  ;;  %v55_v39 = vld [vmem:[%s4519_s2 + $0x70] sm:$0xff]  ;;  %4558 = vst [vmem:[#allocation9_spill] sm:$0xff] %v3883_v40  ;;  %4559 = vst [vmem:[#allocation10_spill] sm:$0xff] %v3885_v41  ;;  %v3317_v2 = vmov 0  }
  0xb8   :  { %2917 = vmatpush3.bf16.msra.mxu0 %v3656_v63  ;;  %2949 = vmatpush3.bf16.msra.mxu1 %v3658_v5  ;;  %v3898_v47 = vpack.c.bf16 %v56_v42, %v55_v39  ;;  %4561 = vst [vmem:[#allocation12_spill] sm:$0xff] %v3900_v48 }
  0xb9   :  { %2919 = vmatprep.subr.bf16.mxu0 %v3666_v8  ;;  %2951 = vmatprep.subr.bf16.mxu1 %v3668_v11  ;;  %4553 = vst [vmem:[#allocation4_spill] sm:$0xff] %v3840_v18 }
  0xba   :  { %4560 = vst [vmem:[#allocation11_spill] sm:$0xff] %v3898_v47  ;;  %3288 = vset.pattern.permute.xlu0 %v3317_v2  ;;  %3289 = vset.pattern.permute.xlu1 %v3317_v2 }
  0xbc   :  { %2921 = vmatpush3.bf16.msra.mxu0 %v3694_v21  ;;  %2953 = vmatpush3.bf16.msra.mxu1 %v3696_v22 }
  0xbd   :  { %2923 = vmatprep.subr.bf16.mxu0 %v3706_v25  ;;  %2955 = vmatprep.subr.bf16.mxu1 %v3708_v26 }
  0xc0   :  { %2925 = vmatpush3.bf16.msra.mxu0 %v3730_v33  ;;  %2957 = vmatpush3.bf16.msra.mxu1 %v3732_v34 }
  0xc1   :  { %2927 = vmatprep.subr.bf16.mxu0 %v3742_v37  ;;  %2959 = vmatprep.subr.bf16.mxu1 %v3744_v38 }
  0xc4   :  { %2929 = vmatpush3.bf16.msra.mxu0 %v3766_v45  ;;  %2961 = vmatpush3.bf16.msra.mxu1 %v3768_v46 }
  0xc5   :  { %2931 = vmatprep.subr.bf16.mxu0 %v3778_v49  ;;  %2963 = vmatprep.subr.bf16.mxu1 %v3780_v50 }
  0xc8   :  { %2933 = vmatpush3.bf16.msra.mxu0 %v3802_v57  ;;  %2965 = vmatpush3.bf16.msra.mxu1 %v3804_v58 }
  0xc9   :  { %2935 = vmatprep.subr.bf16.mxu0 %v3814_v0  ;;  %2967 = vmatprep.subr.bf16.mxu1 %v3816_v1 }
  0xcc   :  { %2937 = vmatpush3.bf16.msra.mxu0 %v3838_v16  ;;  %2969 = vmatpush3.bf16.msra.mxu1 %v3840_v18 }
  0xcd   :  { %2939 = vmatprep.subr.bf16.mxu0 %v3850_v23  ;;  %2971 = vmatprep.subr.bf16.mxu1 %v3852_v24 }
  0xd0   :  { %2941 = vmatpush3.bf16.msra.mxu0 %v3874_v35  ;;  %2973 = vmatpush3.bf16.msra.mxu1 %v3876_v36 }
  0xd1   :  { %2943 = vmatprep.subr.bf16.mxu0 %v3883_v40  ;;  %2975 = vmatprep.subr.bf16.mxu1 %v3885_v41 }
  0xd4   :  { %2945 = vmatpush3.bf16.msra.mxu0 %v3898_v47  ;;  %2977 = vmatpush3.bf16.msra.mxu1 %v3900_v48 }
  0xd5   :  { %2979 = vmatprep.subr.bf16.mxu0 %v3652_v61  ;;  %3011 = vmatprep.subr.bf16.mxu1 %v3654_v62 }
 0x189   :  { %v3908_v51 = vpop.f32.mrb[0].mxu0  ;;  %v3910_v52 = vpop.f32.mrb[0].mxu1 }
 0x18a   :  { %v3912_v53 = vpop.f32.mrb[1].mxu0  ;;  %v3914_v54 = vpop.f32.mrb[1].mxu1  ;;  %v789_v59 = vmul.f32 %v3908_v51, %v3908_v51  ;;  %v791_v3 = vmul.f32 %v3910_v52, %v3910_v52 }
 0x18b   :  { %v790_v55 = vmul.f32 %v3912_v53, %v3912_v53  ;;  %v792_v56 = vmul.f32 %v3914_v54, %v3914_v54  ;;  %713 = vmatprep.mubr.f32.mxu0 %v3912_v53  ;;  %783 = vmatprep.mubr.f32.mxu1 %v3914_v54 }
 0x18c   :  { %714 = vmatmul.mubr.f32.vlgmr.msra.gmra.mrb[2].mxu0 %v3908_v51  ;;  %784 = vmatmul.mubr.f32.vlgmr.msra.gmra.mrb[2].mxu1 %v3910_v52 }
 0x18d   :  { %2981 = vmatpush3.bf16.msra.mxu0 %v3656_v63  ;;  %3013 = vmatpush3.bf16.msra.mxu1 %v3658_v5 }
 0x18e   :  { %857 = vmatprep.mubr.f32.mxu0 %v790_v55  ;;  %927 = vmatprep.mubr.f32.mxu1 %v792_v56  ;;  %v965_v55 = vld [vmem:[%s4522_s5] sm:$0xff] }
 0x18f   :  { %2983 = vmatprep.subr.bf16.mxu0 %v3666_v8  ;;  %3015 = vmatprep.subr.bf16.mxu1 %v3668_v11 }
 0x191   :  { %2985 = vmatpush3.bf16.msra.mxu0 %v3694_v21  ;;  %3017 = vmatpush3.bf16.msra.mxu1 %v3696_v22 }
 0x192   :  { %2987 = vmatprep.subr.bf16.mxu0 %v3706_v25  ;;  %3019 = vmatprep.subr.bf16.mxu1 %v3708_v26 }
 0x195   :  { %2989 = vmatpush3.bf16.msra.mxu0 %v3730_v33  ;;  %3021 = vmatpush3.bf16.msra.mxu1 %v3732_v34 }
 0x196   :  { %2991 = vmatprep.subr.bf16.mxu0 %v3742_v37  ;;  %3023 = vmatprep.subr.bf16.mxu1 %v3744_v38 }
 0x199   :  { %2993 = vmatpush3.bf16.msra.mxu0 %v3766_v45  ;;  %3025 = vmatpush3.bf16.msra.mxu1 %v3768_v46 }
 0x19a   :  { %2995 = vmatprep.subr.bf16.mxu0 %v3778_v49  ;;  %3027 = vmatprep.subr.bf16.mxu1 %v3780_v50 }
 0x19d   :  { %2997 = vmatpush3.bf16.msra.mxu0 %v3802_v57  ;;  %3029 = vmatpush3.bf16.msra.mxu1 %v3804_v58 }
 0x19e   :  { %2999 = vmatprep.subr.bf16.mxu0 %v3814_v0  ;;  %3031 = vmatprep.subr.bf16.mxu1 %v3816_v1 }
 0x1a1   :  { %3001 = vmatpush3.bf16.msra.mxu0 %v3838_v16  ;;  %3033 = vmatpush3.bf16.msra.mxu1 %v3840_v18 }
 0x1a2   :  { %3003 = vmatprep.subr.bf16.mxu0 %v3850_v23  ;;  %3035 = vmatprep.subr.bf16.mxu1 %v3852_v24 }
 0x1a5   :  { %3005 = vmatpush3.bf16.msra.mxu0 %v3874_v35  ;;  %3037 = vmatpush3.bf16.msra.mxu1 %v3876_v36 }
 0x1a6   :  { %3007 = vmatprep.subr.bf16.mxu0 %v3883_v40  ;;  %3039 = vmatprep.subr.bf16.mxu1 %v3885_v41 }
 0x1a9   :  { %3009 = vmatpush3.bf16.msra.mxu0 %v3898_v47  ;;  %3041 = vmatpush3.bf16.msra.mxu1 %v3900_v48 }
 0x1ac   :  { %858 = vmatmul.mubr.f32.vlgmr.msra.gmra.mrb[4].mxu0 %v789_v59  ;;  %928 = vmatmul.mubr.f32.vlgmr.msra.gmra.mrb[4].mxu1 %v791_v3 }
 0x1ad   :  { %1435 = vmatprep.mubr.f32.mxu0 %v4530_v4  ;;  %1524 = vmatprep.mubr.f32.mxu1 %v4530_v4 }
 0x25f   :  { %v2486_v60 = vpop.f32.mrb[2].mxu0  ;;  %v2521_v6 = vpop.f32.mrb[2].mxu1 }
 0x260   :  { %v2487_v7 = vpop.f32.mrb[3].mxu0  ;;  %v2522_v12 = vpop.f32.mrb[3].mxu1 }
 0x261   :  { %v2488_v15 = vadd.f32 %v2487_v7, %v2486_v60  ;;  %v2523_v19 = vadd.f32 %v2522_v12, %v2521_v6 }
 0x263   :  { %v786_v20 = vadd.f32 %v2523_v19, %v2488_v15 }
 0x265   :  { %v934_v27 = vsel %vm933_vm9, %v786_v20, 0.0 }
 0x266   :  { %935 = vadd.xlane.f32.xlu0 %v934_v27 }
 0x27c   :  { %958 = vperm.xlu0 %3288, %v945_v28  }
 0x27f   :  { %v2556_v29 = vpop.f32.mrb[4].mxu0  ;;  %v2591_v30 = vpop.f32.mrb[4].mxu1 }
 0x280   :  { %v2557_v31 = vpop.f32.mrb[5].mxu0  ;;  %v2592_v32 = vpop.f32.mrb[5].mxu1 }
 0x281   :  { %v2558_v39 = vadd.f32 %v2557_v31, %v2556_v29  ;;  %v2593_v42 = vadd.f32 %v2592_v32, %v2591_v30 }
 0x283   :  { %v930_v43 = vadd.f32 %v2593_v42, %v2558_v39 }
 0x285   :  { %v937_v44 = vsel %vm933_vm9, %v930_v43, 0.0 }
 0x286   :  { %938 = vadd.xlane.f32.xlu1 %v937_v44 }
 0x297   :  { %968 = vperm.xlu1 %3289, %v965_v55  }
 0x2f3   :  { %v936_v56 = vpop.xlane.xlu0 %935 }
 0x2f4   :  { %v940_v59 = vmul.f32 0.001953125, %v936_v56 }
 0x2f6   :  { %v942_v60 = vmul.f32 %v940_v59, %v940_v59  ;;  %v946_v15 = vsub.f32 %v3908_v51, %v940_v59  ;;  %v947_v19 = vsub.f32 %v3912_v53, %v940_v59  ;;  %v948_v20 = vsub.f32 %v3910_v52, %v940_v59 }
 0x2f7   :  { %v949_v44 = vsub.f32 %v3914_v54, %v940_v59 }
 0x2fb   :  { %v959_v28 = vpop.permute.xlu0 %958 }
 0x313   :  { %v939_v3 = vpop.xlane.xlu1 %938 }
 0x314   :  { %v941_v2 = vmul.f32 0.001953125, %v939_v3 }
 0x316   :  { %v943_v6 = vsub.f32 %v941_v2, %v942_v60 }
 0x317   :  { %v969_v32 = vpop.permute.xlu1 %968 }
 0x318   :  { %v944_v7 = vmax.f32 %v943_v6, 0.0 }
 0x31a   :  { %v950_v12 = vadd.f32 1e-05, %v944_v7 }
 0x31c   :  { %3290 = vrsqrt.f32 %v950_v12 }
 0x326   :  { %v3291_v27 = vpop.eup %3290 }
 0x327   :  { %v952_v29 = vmul.f32 %v3291_v27, %v946_v15  ;;  %v953_v30 = vmul.f32 %v3291_v27, %v947_v19  ;;  %v954_v31 = vmul.f32 %v3291_v27, %v948_v20  ;;  %v955_v3 = vmul.f32 %v3291_v27, %v949_v44 }
 0x329   :  { %v961_v39 = vmul.f32 %v959_v28, %v952_v29  ;;  %v962_v42 = vmul.f32 %v959_v28, %v953_v30  ;;  %v963_v43 = vmul.f32 %v959_v28, %v954_v31  ;;  %v964_v52 = vmul.f32 %v959_v28, %v955_v3  ;;  %v991_v29 = vld [vmem:[%s4518_s1] ss:$8 sm:$0xf]  ;;  %v2436_v30 = vld [vmem:[%s4518_s1 + $0x1] ss:$8 sm:$0xf] }
 0x32a   :  { %v1046_v3 = vrot.slane %v2436_v30, %v3484_v14  ;;  %v1050_v41 = vrot.slane %v2436_v30, %v3486_v17  ;;  %v1004_v36 = vrot.slane %v991_v29, %v3484_v14 }
 0x32b   :  { %v971_v55 = vadd.f32 %v969_v32, %v961_v39  ;;  %v973_v56 = vadd.f32 %v969_v32, %v963_v43  ;;  %v972_v2 = vadd.f32 %v969_v32, %v962_v42  ;;  %v974_v54 = vadd.f32 %v969_v32, %v964_v52 }
 0x32c   :  { %v1000_v32 = vrot.slane %v991_v29, %v3473_v10  ;;  %v1042_v39 = vrot.slane %v2436_v30, %v3473_v10  ;;  %v996_v43 = vrot.slane %v991_v29, %v3482_v13  ;;  %v1038_v52 = vrot.slane %v2436_v30, %v3482_v13 }
 0x32d   :  { %v3972_v51 = vmax.f32 %v971_v55, 0.0  ;;  %v3974_v53 = vmax.f32 %v973_v56, 0.0  ;;  %v3980_v60 = vmax.f32 %v972_v2, 0.0  ;;  %v3990_v59 = vmax.f32 %v974_v54, 0.0 }
 0x32e   :  { %v1008_v56 = vrot.slane %v991_v29, %v3486_v17 }
 0x32f   :  { %1025 = vrot.lane.b32.xlu0 %v3974_v53, %s3309_s30  ;;  %979 = vrot.lane.b32.xlu1 %v3972_v51, %s3308_s25 }
 0x333   :  { %1063 = vrot.lane.b32.xlu0 %v3972_v51, %s3310_s0  ;;  %981 = vrot.lane.b32.xlu1 %v3980_v60, %s3308_s25 }
 0x337   :  { %1067 = vrot.lane.b32.xlu0 %v3974_v53, %s3310_s0  ;;  %983 = vrot.lane.b32.xlu1 %v3974_v53, %s3308_s25 }
 0x33b   :  { %1105 = vrot.lane.b32.xlu0 %v3972_v51, %s3311_s13  ;;  %985 = vrot.lane.b32.xlu1 %v3990_v59, %s3308_s25 }
 0x33f   :  { %1109 = vrot.lane.b32.xlu0 %v3974_v53, %s3311_s13  ;;  %1021 = vrot.lane.b32.xlu1 %v3972_v51, %s3309_s30 }
 0x343   :  { %1151 = vrot.lane.b32.xlu0 %v3972_v51, %s3312_s14  ;;  %1023 = vrot.lane.b32.xlu1 %v3980_v60, %s3309_s30 }
 0x347   :  { %1155 = vrot.lane.b32.xlu0 %v3974_v53, %s3312_s14  ;;  %1027 = vrot.lane.b32.xlu1 %v3990_v59, %s3309_s30 }
 0x34b   :  { %1193 = vrot.lane.b32.xlu0 %v3972_v51, %s3313_s15  ;;  %1065 = vrot.lane.b32.xlu1 %v3980_v60, %s3310_s0 }
 0x34f   :  { %1197 = vrot.lane.b32.xlu0 %v3974_v53, %s3313_s15  ;;  %1069 = vrot.lane.b32.xlu1 %v3990_v59, %s3310_s0 }
 0x353   :  { %1235 = vrot.lane.b32.xlu0 %v3972_v51, %s3314_s16  ;;  %1107 = vrot.lane.b32.xlu1 %v3980_v60, %s3311_s13 }
 0x357   :  { %1239 = vrot.lane.b32.xlu0 %v3974_v53, %s3314_s16  ;;  %1111 = vrot.lane.b32.xlu1 %v3990_v59, %s3311_s13 }
 0x35b   :  { %1277 = vrot.lane.b32.xlu0 %v3972_v51, %s3316_s17  ;;  %1153 = vrot.lane.b32.xlu1 %v3980_v60, %s3312_s14 }
 0x35f   :  { %1281 = vrot.lane.b32.xlu0 %v3974_v53, %s3316_s17  ;;  %1157 = vrot.lane.b32.xlu1 %v3990_v59, %s3312_s14 }
 0x363   :  { %1195 = vrot.lane.b32.xlu1 %v3980_v60, %s3313_s15 }
 0x367   :  { %1199 = vrot.lane.b32.xlu1 %v3990_v59, %s3313_s15 }
 0x36b   :  { %1237 = vrot.lane.b32.xlu1 %v3980_v60, %s3314_s16 }
 0x36f   :  { %1241 = vrot.lane.b32.xlu1 %v3990_v59, %s3314_s16 }
 0x373   :  { %1279 = vrot.lane.b32.xlu1 %v3980_v60, %s3316_s17 }
 0x377   :  { %1283 = vrot.lane.b32.xlu1 %v3990_v59, %s3316_s17 }
 0x3a1   :  { %v1026_v6 = vpop.permute.xlu0 %1025  ;;  %v980_v7 = vpop.permute.xlu1 %979 }
 0x3a5   :  { %v4044_v12 = vpop.permute.xlu0 %1063  ;;  %v982_v15 = vpop.permute.xlu1 %981 }
 0x3a6   :  { %v989_v42 = vsel %vm119_vm0, %v980_v7, %v982_v15 }
 0x3a7   :  { %v1014_v54 = vmul.f32 %v1000_v32, %v989_v42 }
 0x3a9   :  { %v4046_v19 = vpop.permute.xlu0 %1067  ;;  %v984_v20 = vpop.permute.xlu1 %983 }
 0x3aa   :  { %v988_v40 = vsel %vm119_vm0, %v982_v15, %v984_v20 }
 0x3ad   :  { %v986_v27 = vpop.permute.xlu1 %985  ;;  %v4048_v28 = vpop.permute.xlu0 %1105 }
 0x3ae   :  { %v987_v47 = vsel %vm119_vm0, %v984_v20, %v986_v27  ;;  %v990_v24 = vsel %vm119_vm0, %v986_v27, %v980_v7  ;;  %v1015_v7 = vmul.f32 %v1004_v36, %v988_v40 }
 0x3af   :  { %v1016_v29 = vmul.f32 %v1008_v56, %v987_v47  ;;  %v2439_v56 = vld [vmem:[%s4518_s1 + $0x5] ss:$8 sm:$0xf] }
 0x3b1   :  { %v1022_v31 = vpop.permute.xlu1 %1021  ;;  %v1110_v44 = vpop.permute.xlu0 %1109 }
 0x3b5   :  { %v1024_v55 = vpop.permute.xlu1 %1023 }
 0x3b6   :  { %v1031_v2 = vsel %vm162_vm1, %v1022_v31, %v1024_v55  ;;  %v1030_v4 = vsel %vm162_vm1, %v1024_v55, %v1026_v6  ;;  %v4080_v55 = vpop.permute.xlu0 %1151 }
 0x3b7   :  { %v1056_v48 = vmul.f32 %v1042_v39, %v1031_v2  ;;  %v1057_v32 = vmul.f32 %v1046_v3, %v1030_v4  ;;  %v1013_v39 = vmul.f32 %v996_v43, %v990_v24  ;;  %v2437_v4 = vld [vmem:[%s4518_s1 + $0x2] ss:$8 sm:$0xf] }
 0x3b8   :  { %v1080_v40 = vrot.slane %v2437_v4, %v3482_v13 }
 0x3b9   :  { %v1028_v18 = vpop.permute.xlu1 %1027  ;;  %v3042_v35 = vpack.c.bf16 %v1056_v48, %v1014_v54  ;;  %v3060_v20 = vpack.c.bf16 %v1057_v32, %v1015_v7  ;;  %v1092_v48 = vrot.slane %v2437_v4, %v3486_v17 }
 0x3ba   :  { %v1029_v42 = vsel %vm162_vm1, %v1026_v6, %v1028_v18  ;;  %v1032_v30 = vsel %vm162_vm1, %v1028_v18, %v1022_v31  ;;  %v2438_v18 = vld [vmem:[%s4518_s1 + $0x3] ss:$8 sm:$0xf]  ;;  %v1156_v24 = vpop.permute.xlu0 %1155 }
 0x3bb   :  { %v1055_v2 = vmul.f32 %v1038_v52, %v1032_v30  ;;  %v1058_v1 = vmul.f32 %v1050_v41, %v1029_v42  ;;  %3043 = vmatprep.subr.bf16.mxu0 %v3042_v35  ;;  %v1084_v35 = vrot.slane %v2437_v4, %v3473_v10  ;;  %v1126_v36 = vrot.slane %v2438_v18, %v3473_v10 }
 0x3bc   :  { %v1130_v6 = vrot.slane %v2438_v18, %v3484_v14  ;;  %v1122_v43 = vrot.slane %v2438_v18, %v3482_v13  ;;  %v1134_v42 = vrot.slane %v2438_v18, %v3486_v17  ;;  %v1088_v30 = vrot.slane %v2437_v4, %v3484_v14 }
 0x3bd   :  { %v3044_v27 = vpack.c.bf16 %v1055_v2, %v1013_v39  ;;  %v1066_v23 = vpop.permute.xlu1 %1065  ;;  %v3058_v15 = vpack.c.bf16 %v1058_v1, %v1016_v29 }
 0x3be   :  { %v1073_v1 = vsel %vm206_vm2, %v4044_v12, %v1066_v23  ;;  %v4103_v3 = vpop.permute.xlu0 %1193  ;;  %v1072_v2 = vsel %vm206_vm2, %v1066_v23, %v4046_v19 }
 0x3bf   :  { %3045 = vmatpush1.bf16.msra.mxu0 %v3044_v27  ;;  %3059 = vmatprep.subr.bf16.mxu1 %v3058_v15  ;;  %v1098_v52 = vmul.f32 %v1084_v35, %v1073_v1  ;;  %v1168_v15 = vrot.slane %v2439_v56, %v3482_v13  ;;  %v1172_v35 = vrot.slane %v2439_v56, %v3473_v10 }
 0x3c0   :  { %3061 = vmatpush1.bf16.msra.mxu1 %v3060_v20  ;;  %v1099_v23 = vmul.f32 %v1088_v30, %v1072_v2 }
 0x3c1   :  { %v1070_v47 = vpop.permute.xlu1 %1069 }
 0x3c2   :  { %v1071_v39 = vsel %vm206_vm2, %v4046_v19, %v1070_v47  ;;  %v1074_v29 = vsel %vm206_vm2, %v1070_v47, %v4044_v12  ;;  %v1198_v19 = vpop.permute.xlu0 %1197  ;;  %vm3319_vm2 = vmmov 0  }
 0x3c3   :  { %v1100_v12 = vmul.f32 %v1092_v48, %v1071_v39 }
 0x3c5   :  { %v1108_v41 = vpop.permute.xlu1 %1107 }
 0x3c6   :  { %v1115_v31 = vsel %vm250_vm3, %v4048_v28, %v1108_v41  ;;  %v1114_v54 = vsel %vm250_vm3, %v1108_v41, %v1110_v44  ;;  %v1236_v2 = vpop.permute.xlu0 %1235 }
 0x3c7   :  { %v1140_v32 = vmul.f32 %v1126_v36, %v1115_v31  ;;  %v1141_v20 = vmul.f32 %v1130_v6, %v1114_v54  ;;  %v1097_v36 = vmul.f32 %v1080_v40, %v1074_v29  ;;  %v1176_v54 = vrot.slane %v2439_v56, %v3484_v14 }
 0x3c9   :  { %v1112_v7 = vpop.permute.xlu1 %1111  ;;  %v3046_v27 = vpack.c.bf16 %v1140_v32, %v1098_v52  ;;  %v3064_v6 = vpack.c.bf16 %v1141_v20, %v1099_v23 }
 0x3ca   :  { %v1113_v4 = vsel %vm250_vm3, %v1110_v44, %v1112_v7  ;;  %v1116_v18 = vsel %vm250_vm3, %v1112_v7, %v4048_v28  ;;  %vm2329_vm3 = vcmask 261120  }
 0x3cb   :  { %v1139_v47 = vmul.f32 %v1122_v43, %v1116_v18  ;;  %v1142_v1 = vmul.f32 %v1134_v42, %v1113_v4  ;;  %3047 = vmatprep.subr.bf16.mxu0 %v3046_v27  ;;  %v1180_v43 = vrot.slane %v2439_v56, %v3486_v17 }
 0x3cd   :  { %v3048_v41 = vpack.c.bf16 %v1139_v47, %v1097_v36  ;;  %v1154_v31 = vpop.permute.xlu1 %1153  ;;  %v3062_v52 = vpack.c.bf16 %v1142_v1, %v1100_v12 }
 0x3ce   :  { %v1160_v44 = vsel %vm298_vm4, %v1154_v31, %v1156_v24  ;;  %v1161_v28 = vsel %vm298_vm4, %v4080_v55, %v1154_v31 }
 0x3cf   :  { %v1185_v40 = vmul.f32 %v1168_v15, %v1161_v28  ;;  %v1186_v48 = vmul.f32 %v1172_v35, %v1160_v44  ;;  %3049 = vmatpush1.bf16.msra.mxu0 %v3048_v41  ;;  %3063 = vmatprep.subr.bf16.mxu1 %v3062_v52 }
 0x3d0   :  { %3065 = vmatpush1.bf16.msra.mxu1 %v3064_v6 }
 0x3d1   :  { %v3052_v32 = vpack.c.bf16 %v1185_v40, %v3972_v51  ;;  %v1158_v42 = vpop.permute.xlu1 %1157  ;;  %v3050_v30 = vpack.c.bf16 %v1186_v48, %v3980_v60  ;;  %v2440_v60 = vld [vmem:[%s4518_s1 + $0x6] ss:$8 sm:$0xf]  ;;  %v2442_v48 = vld [vmem:[%s4518_s1 + $0x20] ss:$8 sm:$0xf] }
 0x3d2   :  { %v1159_v39 = vsel %vm298_vm4, %v1156_v24, %v1158_v42  ;;  %v1162_v29 = vsel %vm298_vm4, %v1158_v42, %v4080_v55  ;;  %v2441_v55 = vld [vmem:[%s4518_s1 + $0x7] ss:$8 sm:$0xf]  ;;  %v1240_v24 = vpop.permute.xlu0 %1239  ;;  %v1210_v4 = vrot.slane %v2440_v60, %v3482_v13  ;;  %v1214_v18 = vrot.slane %v2440_v60, %v3473_v10 }
 0x3d3   :  { %v1187_v7 = vmul.f32 %v1176_v54, %v1159_v39  ;;  %v1188_v27 = vmul.f32 %v1180_v43, %v1162_v29  ;;  %3051 = vmatprep.subr.bf16.mxu0 %v3050_v30  ;;  %v1218_v12 = vrot.slane %v2440_v60, %v3484_v14  ;;  %v1222_v47 = vrot.slane %v2440_v60, %v3486_v17 }
 0x3d4   :  { %3053 = vmatpush1.bf16.msra.mxu0 %v3052_v32  ;;  %v1260_v31 = vrot.slane %v2441_v55, %v3484_v14  ;;  %v1264_v52 = vrot.slane %v2441_v55, %v3486_v17  ;;  %vm2421_vm4 = vcmask 11264  }
 0x3d5   :  { %v3068_v56 = vpack.c.bf16 %v1187_v7, %v3974_v53  ;;  %v1196_v15 = vpop.permute.xlu1 %1195  ;;  %v3066_v51 = vpack.c.bf16 %v1188_v27, %v3990_v59  ;;  %v1252_v53 = vrot.slane %v2441_v55, %v3482_v13  ;;  %v1256_v59 = vrot.slane %v2441_v55, %v3473_v10 }
 0x3d6   :  { %v1202_v35 = vsel %vm342_vm6, %v1196_v15, %v1198_v19  ;;  %v1203_v36 = vsel %vm342_vm6, %v4103_v3, %v1196_v15  ;;  %v1278_v6 = vpop.permute.xlu0 %1277  ;;  %v1294_v27 = vrot.slane %v2442_v48, %v3482_v13 }
 0x3d7   :  { %3067 = vmatprep.subr.bf16.mxu1 %v3066_v51  ;;  %v1227_v44 = vmul.f32 %v1210_v4, %v1203_v36  ;;  %v1228_v28 = vmul.f32 %v1214_v18, %v1202_v35 }
 0x3d8   :  { %3069 = vmatpush1.bf16.msra.mxu1 %v3068_v56  ;;  %v1298_v56 = vrot.slane %v2442_v48, %v3473_v10  ;;  %v1302_v10 = vrot.slane %v2442_v48, %v3484_v14  ;;  %v4562_v14 = vmov 0.0  }
 0x3d9   :  { %v1200_v20 = vpop.permute.xlu1 %1199 }
 0x3da   :  { %v1201_v43 = vsel %vm342_vm6, %v1198_v19, %v1200_v20  ;;  %v1204_v32 = vsel %vm342_vm6, %v1200_v20, %v4103_v3  ;;  %v1282_v3 = vpop.permute.xlu0 %1281 }
 0x3db   :  { %v1229_v15 = vmul.f32 %v1218_v12, %v1201_v43  ;;  %v1230_v51 = vmul.f32 %v1222_v47, %v1204_v32  ;;  %v4572_v43 = vld [vmem:[#allocation12_spill] sm:$0xff] }
 0x3dd   :  { %v1238_v1 = vpop.permute.xlu1 %1237 }
 0x3de   :  { %v1244_v23 = vsel %vm386_vm5, %v1238_v1, %v1240_v24  ;;  %v1245_v41 = vsel %vm386_vm5, %v1236_v2, %v1238_v1 }
 0x3df   :  { %v1269_v54 = vmul.f32 %v1252_v53, %v1245_v41  ;;  %v1270_v40 = vmul.f32 %v1256_v59, %v1244_v23  ;;  %v1306_v53 = vrot.slane %v2442_v48, %v3486_v17  ;;  %v1319_v59 = vld [vmem:[%s4523_s6] sm:$0xff]  ;;  %v1320_v17 = vld [vmem:[%s4523_s6 + $0x8] sm:$0xff]  ;;  %v1322_v23 = vld [vmem:[%s4523_s6 + $0x18] sm:$0xff] }
 0x3e0   :  { %v4563_v41 = vld [vmem:[#allocation5_spill] sm:$0xff]  ;;  %v4571_v48 = vld [vmem:[#allocation10_spill] sm:$0xff] }
 0x3e1   :  { %v3056_v42 = vpack.c.bf16 %v1269_v54, %v1227_v44  ;;  %v1242_v30 = vpop.permute.xlu1 %1241  ;;  %v3054_v39 = vpack.c.bf16 %v1270_v40, %v1228_v28  ;;  %v4567_v44 = vld [vmem:[#allocation9_spill] sm:$0xff]  ;;  %v4568_v28 = vld [vmem:[#allocation6_spill] sm:$0xff]  ;;  %v4569_v54 = vld [vmem:[#allocation11_spill] sm:$0xff] }
 0x3e2   :  { %v1243_v29 = vsel %vm386_vm5, %v1240_v24, %v1242_v30  ;;  %v1246_v7 = vsel %vm386_vm5, %v1242_v30, %v1236_v2  ;;  %v4570_v40 = vld [vmem:[#allocation8_spill] sm:$0xff] }
 0x3e3   :  { %v1271_v19 = vmul.f32 %v1260_v31, %v1243_v29  ;;  %v1272_v60 = vmul.f32 %v1264_v52, %v1246_v7  ;;  %3055 = vmatprep.subr.bf16.mxu0 %v3054_v39  ;;  %v4564_v31 = vld [vmem:[#allocation3_spill] sm:$0xff] }
 0x3e4   :  { %3057 = vmatpush1.bf16.msra.mxu0 %v3056_v42  ;;  %v4565_v52 = vld [vmem:[#allocation7_spill] sm:$0xff] }
 0x3e5   :  { %v3072_v55 = vpack.c.bf16 %v1271_v19, %v1229_v15  ;;  %v1280_v20 = vpop.permute.xlu1 %1279  ;;  %v3070_v4 = vpack.c.bf16 %v1272_v60, %v1230_v51 }
 0x3e6   :  { %v1286_v24 = vsel %vm430_vm7, %v1280_v20, %v1282_v3  ;;  %v1287_v2 = vsel %vm430_vm7, %v1278_v6, %v1280_v20 }
 0x3e7   :  { %v1311_v18 = vmul.f32 %v1294_v27, %v1287_v2  ;;  %v1312_v13 = vmul.f32 %v1298_v56, %v1286_v24  ;;  %3071 = vmatprep.subr.bf16.mxu1 %v3070_v4 }
 0x3e8   :  { %3073 = vmatpush1.bf16.msra.mxu1 %v3072_v55 }
 0x3e9   :  { %1387 = vmatprep.subr.mxu0 %v1312_v13  ;;  %v1284_v35 = vpop.permute.xlu1 %1283 }
 0x3ea   :  { %v1285_v36 = vsel %vm430_vm7, %v1282_v3, %v1284_v35  ;;  %v1288_v12 = vsel %vm430_vm7, %v1284_v35, %v1278_v6  ;;  %1388 = vmatpush1.msra.mxu0 %v1311_v18  ;;  %v4566_v6 = vld [vmem:[#allocation4_spill] sm:$0xff] }
 0x3eb   :  { %v1313_v47 = vmul.f32 %v1302_v10, %v1285_v36  ;;  %v1314_v1 = vmul.f32 %v1306_v53, %v1288_v12  ;;  %2443 = vmatmul.mubr.msk.f32.vlgmr.msra.gmra.mrb[6].mxu0 %vm503_vm8, %v1319_v59  ;;  %3075 = vmatprep.subr.bf16.mxu0 %v3652_v61 }
 0x3ec   :  { %1441 = vmatprep.mubr.f32.mxu0 %v4562_v14  ;;  %3077 = vmatpush3.bf16.msra.mxu0 %v3656_v63 }
 0x3ed   :  { %1476 = vmatprep.subr.mxu1 %v1314_v1  ;;  %3079 = vmatprep.subr.bf16.mxu0 %v3666_v8 }
 0x3ee   :  { %1477 = vmatpush1.msra.mxu1 %v1313_v47 }
 0x3ef   :  { %2444 = vmatmul.mubr.msk.f32.gmra.mrb[8].mxu0 %vm503_vm8, %v1320_v17  ;;  %2447 = vmatmul.mubr.msk.f32.vlgmr.msra.gmra.mrb[6].mxu1 %vm503_vm8, %v1319_v59 }
 0x3f0   :  { %1447 = vmatprep.mubr.f32.mxu0 %v4562_v14  ;;  %1530 = vmatprep.mubr.f32.mxu1 %v4562_v14 }
 0x3f1   :  { %3107 = vmatprep.subr.bf16.mxu1 %v3654_v62  ;;  %3081 = vmatpush3.bf16.msra.mxu0 %v3694_v21 }
 0x3f2   :  { %3109 = vmatpush3.bf16.msra.mxu1 %v3658_v5  ;;  %3083 = vmatprep.subr.bf16.mxu0 %v3706_v25 }
 0x3f3   :  { %2445 = vmatmul.mubr.msk.f32.gmra.mrb[10].mxu0 %vm503_vm8, %v1321_v9  ;;  %2448 = vmatmul.mubr.msk.f32.gmra.mrb[8].mxu1 %vm503_vm8, %v1320_v17  ;;  %v1906_v17 = vld [vmem:[%s4524_s9 + $0x8] sm:$0xff] }
 0x3f4   :  { %1453 = vmatprep.mubr.f32.mxu0 %v4562_v14  ;;  %1536 = vmatprep.mubr.f32.mxu1 %v4562_v14 }
 0x3f5   :  { %3111 = vmatprep.subr.bf16.mxu1 %v3668_v11  ;;  %3085 = vmatpush3.bf16.msra.mxu0 %v3730_v33 }
 0x3f6   :  { %3113 = vmatpush3.bf16.msra.mxu1 %v3696_v22  ;;  %3087 = vmatprep.subr.bf16.mxu0 %v3742_v37 }
 0x3f7   :  { %2446 = vmatmul.mubr.msk.f32.gmra.mrb[12].mxu0 %vm503_vm8, %v1322_v23  ;;  %2449 = vmatmul.mubr.msk.f32.gmra.mrb[10].mxu1 %vm503_vm8, %v1321_v9 }
 0x3f8   :  { %1542 = vmatprep.mubr.f32.mxu1 %v4562_v14  ;;  %3115 = vmatprep.subr.bf16.mxu1 %v3708_v26 }
 0x3f9   :  { %3089 = vmatpush3.bf16.msra.mxu0 %v3766_v45 }
 0x3fa   :  { %3117 = vmatpush3.bf16.msra.mxu1 %v3732_v34  ;;  %3091 = vmatprep.subr.bf16.mxu0 %v3778_v49 }
 0x3fb   :  { %2450 = vmatmul.mubr.msk.f32.gmra.mrb[12].mxu1 %vm503_vm8, %v1322_v23  ;;  %3119 = vmatprep.subr.bf16.mxu1 %v3744_v38 }
 0x3fd   :  { %3093 = vmatpush3.bf16.msra.mxu0 %v3802_v57 }
 0x3fe   :  { %3121 = vmatpush3.bf16.msra.mxu1 %v3768_v46  ;;  %3095 = vmatprep.subr.bf16.mxu0 %v3814_v0 }
 0x3ff   :  { %3123 = vmatprep.subr.bf16.mxu1 %v3780_v50 }
 0x401   :  { %3097 = vmatpush3.bf16.msra.mxu0 %v3838_v16 }
 0x402   :  { %3125 = vmatpush3.bf16.msra.mxu1 %v3804_v58  ;;  %3099 = vmatprep.subr.bf16.mxu0 %v4563_v41 }
 0x403   :  { %3127 = vmatprep.subr.bf16.mxu1 %v4564_v31 }
 0x405   :  { %3101 = vmatpush3.bf16.msra.mxu0 %v4565_v52 }
 0x406   :  { %3129 = vmatpush3.bf16.msra.mxu1 %v4566_v6  ;;  %3103 = vmatprep.subr.bf16.mxu0 %v4567_v44 }
 0x407   :  { %3131 = vmatprep.subr.bf16.mxu1 %v4568_v28 }
 0x409   :  { %3105 = vmatpush3.bf16.msra.mxu0 %v4569_v54 }
 0x40a   :  { %3133 = vmatpush3.bf16.msra.mxu1 %v4570_v40  ;;  %3139 = vmatprep.subr.bf16.mxu0 %v3652_v61 }
 0x40b   :  { %3135 = vmatprep.subr.bf16.mxu1 %v4571_v48 }
 0x40e   :  { %3137 = vmatpush3.bf16.msra.mxu1 %v4572_v43 }
 0x40f   :  { %3171 = vmatprep.subr.bf16.mxu1 %v3654_v62 }
 0x4be   :  { %v4248_v32 = vpop.f32.mrb[6].mxu0 }
 0x4bf   :  { %v4250_v42 = vpop.f32.mrb[7].mxu0  ;;  %v1719_v18 = vmul.f32 %v4248_v32, %v4248_v32 }
 0x4c0   :  { %1613 = vmatprep.mubr.f32.mxu0 %v4250_v42  ;;  %v1720_v20 = vmul.f32 %v4250_v42, %v4250_v42 }
 0x4c1   :  { %1614 = vmatmul.mubr.f32.vlgmr.msra.gmra.mrb[14].mxu0 %v4248_v32 }
 0x4c2   :  { %3141 = vmatpush3.bf16.msra.mxu0 %v3656_v63  ;;  %v4255_v30 = vpop.f32.mrb[8].mxu0  ;;  %v4257_v39 = vpop.f32.mrb[6].mxu1 }
 0x4c3   :  { %v4259_v29 = vpop.f32.mrb[9].mxu0  ;;  %v4261_v7 = vpop.f32.mrb[7].mxu1  ;;  %3143 = vmatprep.subr.bf16.mxu0 %v3666_v8  ;;  %v1723_v10 = vmul.f32 %v4255_v30, %v4255_v30  ;;  %v1721_v53 = vmul.f32 %v4257_v39, %v4257_v39 }
 0x4c4   :  { %1618 = vmatprep.mubr.f32.mxu0 %v4259_v29  ;;  %1698 = vmatprep.mubr.f32.mxu1 %v4261_v7  ;;  %v1722_v2 = vmul.f32 %v4261_v7, %v4261_v7  ;;  %v1724_v13 = vmul.f32 %v4259_v29, %v4259_v29 }
 0x4c5   :  { %1619 = vmatmul.mubr.f32.gmra.mrb[16].mxu0 %v4255_v30  ;;  %1699 = vmatmul.mubr.f32.vlgmr.msra.gmra.mrb[14].mxu1 %v4257_v39 }
 0x4c6   :  { %3145 = vmatpush3.bf16.msra.mxu0 %v3694_v21  ;;  %3173 = vmatpush3.bf16.msra.mxu1 %v3658_v5  ;;  %v4270_v27 = vpop.f32.mrb[10].mxu0  ;;  %v4272_v56 = vpop.f32.mrb[8].mxu1 }
 0x4c7   :  { %v4274_v15 = vpop.f32.mrb[11].mxu0  ;;  %v4276_v51 = vpop.f32.mrb[9].mxu1  ;;  %3147 = vmatprep.subr.bf16.mxu0 %v3706_v25  ;;  %3175 = vmatprep.subr.bf16.mxu1 %v3668_v11  ;;  %v1727_v35 = vmul.f32 %v4270_v27, %v4270_v27 }
 0x4c8   :  { %1623 = vmatprep.mubr.f32.mxu0 %v4274_v15  ;;  %1703 = vmatprep.mubr.f32.mxu1 %v4276_v51  ;;  %v1726_v59 = vmul.f32 %v4276_v51, %v4276_v51 }
 0x4c9   :  { %1624 = vmatmul.mubr.f32.gmra.mrb[18].mxu0 %v4270_v27  ;;  %1704 = vmatmul.mubr.f32.gmra.mrb[16].mxu1 %v4272_v56 }
 0x4ca   :  { %3149 = vmatpush3.bf16.msra.mxu0 %v3730_v33  ;;  %3177 = vmatpush3.bf16.msra.mxu1 %v3696_v22  ;;  %v4286_v19 = vpop.f32.mrb[12].mxu0  ;;  %v4288_v60 = vpop.f32.mrb[10].mxu1 }
 0x4cb   :  { %v4290_v3 = vpop.f32.mrb[13].mxu0  ;;  %v4292_v55 = vpop.f32.mrb[11].mxu1  ;;  %3151 = vmatprep.subr.bf16.mxu0 %v3742_v37  ;;  %3179 = vmatprep.subr.bf16.mxu1 %v3708_v26  ;;  %v1731_v36 = vmul.f32 %v4286_v19, %v4286_v19 }
 0x4cc   :  { %1628 = vmatprep.mubr.f32.mxu0 %v4290_v3  ;;  %1708 = vmatprep.mubr.f32.mxu1 %v4292_v55 }
 0x4cd   :  { %1629 = vmatmul.mubr.f32.gmra.mrb[20].mxu0 %v4286_v19  ;;  %1709 = vmatmul.mubr.f32.gmra.mrb[18].mxu1 %v4288_v60 }
 0x4ce   :  { %3153 = vmatpush3.bf16.msra.mxu0 %v3766_v45  ;;  %3181 = vmatpush3.bf16.msra.mxu1 %v3732_v34  ;;  %v4304_v4 = vpop.f32.mrb[12].mxu1 }
 0x4cf   :  { %1799 = vmatprep.mubr.f32.mxu0 %v1720_v20  ;;  %v4306_v24 = vpop.f32.mrb[13].mxu1  ;;  %3155 = vmatprep.subr.bf16.mxu0 %v3778_v49 }
 0x4d0   :  { %1713 = vmatprep.mubr.f32.mxu1 %v4306_v24  ;;  %3183 = vmatprep.subr.bf16.mxu1 %v3744_v38 }
 0x4d1   :  { %1714 = vmatmul.mubr.f32.gmra.mrb[20].mxu1 %v4304_v4 }
 0x4d2   :  { %3157 = vmatpush3.bf16.msra.mxu0 %v3802_v57  ;;  %3185 = vmatpush3.bf16.msra.mxu1 %v3768_v46 }
 0x4d3   :  { %1884 = vmatprep.mubr.f32.mxu1 %v1722_v2  ;;  %3159 = vmatprep.subr.bf16.mxu0 %v3814_v0 }
 0x4d4   :  { %3187 = vmatprep.subr.bf16.mxu1 %v3780_v50 }
 0x4d6   :  { %3161 = vmatpush3.bf16.msra.mxu0 %v3838_v16  ;;  %3189 = vmatpush3.bf16.msra.mxu1 %v3804_v58 }
 0x4d7   :  { %3163 = vmatprep.subr.bf16.mxu0 %v4563_v41  ;;  %3191 = vmatprep.subr.bf16.mxu1 %v4564_v31 }
 0x4da   :  { %3165 = vmatpush3.bf16.msra.mxu0 %v4565_v52  ;;  %3193 = vmatpush3.bf16.msra.mxu1 %v4566_v6 }
 0x4db   :  { %3167 = vmatprep.subr.bf16.mxu0 %v4567_v44  ;;  %3195 = vmatprep.subr.bf16.mxu1 %v4568_v28 }
 0x4de   :  { %3169 = vmatpush3.bf16.msra.mxu0 %v4569_v54  ;;  %3197 = vmatpush3.bf16.msra.mxu1 %v4570_v40 }
 0x4df   :  { %3199 = vmatprep.subr.bf16.mxu1 %v4571_v48  ;;  %3203 = vmatprep.subr.bf16.mxu0 %v3652_v61  ;;  %v1728_v61 = vmul.f32 %v4274_v15, %v4274_v15 }
 0x4e1   :  { %1800 = vmatmul.mubr.f32.vlgmr.msra.gmra.mrb[22].mxu0 %v1719_v18 }
 0x4e2   :  { %1804 = vmatprep.mubr.f32.mxu0 %v1724_v13  ;;  %3201 = vmatpush3.bf16.msra.mxu1 %v4572_v43 }
 0x4e3   :  { %3235 = vmatprep.subr.bf16.mxu1 %v3654_v62  ;;  %3205 = vmatpush3.bf16.msra.mxu0 %v3656_v63  ;;  %v1725_v62 = vmul.f32 %v4272_v56, %v4272_v56  ;;  %v1732_v63 = vmul.f32 %v4290_v3, %v4290_v3 }
 0x4e4   :  { %3207 = vmatprep.subr.bf16.mxu0 %v3666_v8  ;;  %v1730_v8 = vmul.f32 %v4292_v55, %v4292_v55 }
 0x4e5   :  { %1805 = vmatmul.mubr.f32.gmra.mrb[24].mxu0 %v1723_v10  ;;  %1885 = vmatmul.mubr.f32.vlgmr.msra.gmra.mrb[22].mxu1 %v1721_v53 }
 0x4e6   :  { %1809 = vmatprep.mubr.f32.mxu0 %v1728_v61  ;;  %1889 = vmatprep.mubr.f32.mxu1 %v1726_v59 }
 0x4e7   :  { %3237 = vmatpush3.bf16.msra.mxu1 %v3658_v5  ;;  %3209 = vmatpush3.bf16.msra.mxu0 %v3694_v21  ;;  %v1729_v5 = vmul.f32 %v4288_v60, %v4288_v60  ;;  %v1734_v21 = vmul.f32 %v4306_v24, %v4306_v24 }
 0x4e8   :  { %3239 = vmatprep.subr.bf16.mxu1 %v3668_v11  ;;  %3211 = vmatprep.subr.bf16.mxu0 %v3706_v25  ;;  %v1733_v11 = vmul.f32 %v4304_v4, %v4304_v4 }
 0x4e9   :  { %1810 = vmatmul.mubr.f32.gmra.mrb[26].mxu0 %v1727_v35  ;;  %1890 = vmatmul.mubr.f32.gmra.mrb[24].mxu1 %v1725_v62 }
 0x4ea   :  { %1814 = vmatprep.mubr.f32.mxu0 %v1732_v63  ;;  %1894 = vmatprep.mubr.f32.mxu1 %v1730_v8 }
 0x4eb   :  { %3241 = vmatpush3.bf16.msra.mxu1 %v3696_v22  ;;  %3213 = vmatpush3.bf16.msra.mxu0 %v3730_v33 }
 0x4ec   :  { %3243 = vmatprep.subr.bf16.mxu1 %v3708_v26  ;;  %3215 = vmatprep.subr.bf16.mxu0 %v3742_v37 }
 0x4ed   :  { %1815 = vmatmul.mubr.f32.gmra.mrb[28].mxu0 %v1731_v36  ;;  %1895 = vmatmul.mubr.f32.gmra.mrb[26].mxu1 %v1729_v5 }
 0x4ee   :  { %1899 = vmatprep.mubr.f32.mxu1 %v1734_v21 }
 0x4ef   :  { %3245 = vmatpush3.bf16.msra.mxu1 %v3732_v34  ;;  %3217 = vmatpush3.bf16.msra.mxu0 %v3766_v45 }
 0x4f0   :  { %3247 = vmatprep.subr.bf16.mxu1 %v3744_v38  ;;  %3219 = vmatprep.subr.bf16.mxu0 %v3778_v49  ;;  %v1905_v49 = vld [vmem:[%s4524_s9] sm:$0xff] }
 0x4f1   :  { %1900 = vmatmul.mubr.f32.gmra.mrb[28].mxu1 %v1733_v11  ;;  %v1929_v36 = vmul.f32 %v1905_v49, %v1905_v49 }
 0x4f3   :  { %3249 = vmatpush3.bf16.msra.mxu1 %v3768_v46  ;;  %3221 = vmatpush3.bf16.msra.mxu0 %v3802_v57 }
 0x4f4   :  { %3251 = vmatprep.subr.bf16.mxu1 %v3780_v50  ;;  %3223 = vmatprep.subr.bf16.mxu0 %v3814_v0 }
 0x4f7   :  { %3253 = vmatpush3.bf16.msra.mxu1 %v3804_v58  ;;  %3225 = vmatpush3.bf16.msra.mxu0 %v3838_v16 }
 0x4f8   :  { %3255 = vmatprep.subr.bf16.mxu1 %v4564_v31  ;;  %3227 = vmatprep.subr.bf16.mxu0 %v4563_v41 }
 0x4fb   :  { %3257 = vmatpush3.bf16.msra.mxu1 %v4566_v6  ;;  %3229 = vmatpush3.bf16.msra.mxu0 %v4565_v52 }
 0x4fc   :  { %3259 = vmatprep.subr.bf16.mxu1 %v4568_v28  ;;  %3231 = vmatprep.subr.bf16.mxu0 %v4567_v44 }
 0x4ff   :  { %3261 = vmatpush3.bf16.msra.mxu1 %v4570_v40  ;;  %3233 = vmatpush3.bf16.msra.mxu0 %v4569_v54 }
 0x500   :  { %3263 = vmatprep.subr.bf16.mxu1 %v4571_v48 }
 0x503   :  { %3265 = vmatpush3.bf16.msra.mxu1 %v4572_v43 }
 0x594   :  { %v2626_v22 = vpop.f32.mrb[14].mxu0 }
 0x595   :  { %v2627_v25 = vpop.f32.mrb[15].mxu0 }
 0x596   :  { %v2628_v26 = vadd.f32 %v2627_v25, %v2626_v22 }
 0x598   :  { %v2670_v33 = vpop.f32.mrb[14].mxu1  ;;  %v2629_v34 = vpop.f32.mrb[16].mxu0 }
 0x599   :  { %v2671_v37 = vpop.f32.mrb[15].mxu1  ;;  %v2630_v38 = vpop.f32.mrb[17].mxu0 }
 0x59a   :  { %v2672_v45 = vadd.f32 %v2671_v37, %v2670_v33  ;;  %v2631_v46 = vadd.f32 %v2630_v38, %v2629_v34  ;;  %v1930_v38 = vmul.f32 %v1906_v17, %v1906_v17 }
 0x59c   :  { %v1701_v50 = vadd.f32 %v2672_v45, %v2628_v26  ;;  %v2673_v57 = vpop.f32.mrb[16].mxu1  ;;  %v2632_v58 = vpop.f32.mrb[18].mxu0  ;;  %v1907_v26 = vld [vmem:[%s4524_s9 + $0x10] sm:$0xff] }
 0x59d   :  { %v2674_v0 = vpop.f32.mrb[17].mxu1  ;;  %v2633_v16 = vpop.f32.mrb[19].mxu0 }
 0x59e   :  { %v2675_v12 = vadd.f32 %v2674_v0, %v2673_v57  ;;  %v1909_v47 = vmul.f32 %v1905_v49, %v1701_v50  ;;  %v2634_v1 = vadd.f32 %v2633_v16, %v2632_v58  ;;  %v1908_v16 = vld [vmem:[%s4524_s9 + $0x18] sm:$0xff] }
 0x5a0   :  { %v1706_v9 = vadd.f32 %v2675_v12, %v2631_v46  ;;  %v1913_v23 = vsel %vm933_vm9, %v1909_v47, 0.0  ;;  %v2676_v41 = vpop.f32.mrb[18].mxu1  ;;  %v2635_v31 = vpop.f32.mrb[20].mxu0 }
 0x5a1   :  { %1914 = vadd.xlane.f32.xlu0 %v1913_v23  ;;  %v2677_v52 = vpop.f32.mrb[19].mxu1  ;;  %v2636_v6 = vpop.f32.mrb[21].mxu0 }
 0x5a2   :  { %v1910_v44 = vmul.f32 %v1906_v17, %v1706_v9  ;;  %v2678_v28 = vadd.f32 %v2677_v52, %v2676_v41  ;;  %v2637_v54 = vadd.f32 %v2636_v6, %v2635_v31  ;;  %v1931_v9 = vmul.f32 %v1907_v26, %v1907_v26 }
 0x5a4   :  { %v1916_v40 = vsel %vm933_vm9, %v1910_v44, 0.0  ;;  %v1711_v48 = vadd.f32 %v2678_v28, %v2634_v1  ;;  %v2679_v43 = vpop.f32.mrb[20].mxu1 }
 0x5a5   :  { %1917 = vadd.xlane.f32.xlu1 %v1916_v40  ;;  %v2680_v20 = vpop.f32.mrb[21].mxu1 }
 0x5a6   :  { %v2681_v2 = vadd.f32 %v2680_v20, %v2679_v43  ;;  %v1911_v58 = vmul.f32 %v1907_v26, %v1711_v48 }
 0x5a8   :  { %v1716_v18 = vadd.f32 %v2681_v2, %v2637_v54  ;;  %v1919_v31 = vsel %vm933_vm9, %v1911_v58, 0.0  ;;  %v1932_v54 = vmul.f32 %v1908_v16, %v1908_v16 }
 0x5aa   :  { %v1912_v52 = vmul.f32 %v1908_v16, %v1716_v18  ;;  %v2006_v18 = vld [vmem:[%s4525_s7] sm:$0xff] }
 0x5ac   :  { %v1922_v43 = vsel %vm933_vm9, %v1912_v52, 0.0 }
 0x5b4   :  { %v2714_v13 = vpop.f32.mrb[22].mxu0 }
 0x5b5   :  { %v2715_v10 = vpop.f32.mrb[23].mxu0 }
 0x5b6   :  { %v2716_v53 = vadd.f32 %v2715_v10, %v2714_v13  ;;  %v2007_v13 = vld [vmem:[%s4525_s7 + $0x8] sm:$0xff] }
 0x5b7   :  { %v2079_v10 = vld [vmem:[%s4526_s8 + $0x8] sm:$0xff] }
 0x5b8   :  { %v2717_v61 = vpop.f32.mrb[24].mxu0  ;;  %v2758_v59 = vpop.f32.mrb[22].mxu1 }
 0x5b9   :  { %v2718_v35 = vpop.f32.mrb[25].mxu0  ;;  %v2759_v62 = vpop.f32.mrb[23].mxu1 }
 0x5ba   :  { %v2719_v63 = vadd.f32 %v2718_v35, %v2717_v61  ;;  %v2760_v8 = vadd.f32 %v2759_v62, %v2758_v59  ;;  %v2080_v61 = vld [vmem:[%s4526_s8 + $0x10] sm:$0xff]  ;;  %v2081_v35 = vld [vmem:[%s4526_s8 + $0x18] sm:$0xff] }
 0x5bb   :  { %v2008_v59 = vld [vmem:[%s4525_s7 + $0x10] sm:$0xff]  ;;  %v2009_v62 = vld [vmem:[%s4525_s7 + $0x18] sm:$0xff] }
 0x5bc   :  { %v1887_v5 = vadd.f32 %v2760_v8, %v2716_v53  ;;  %v2720_v21 = vpop.f32.mrb[26].mxu0  ;;  %v2761_v11 = vpop.f32.mrb[24].mxu1  ;;  %v2078_v53 = vld [vmem:[%s4526_s8] sm:$0xff] }
 0x5bd   :  { %v2721_v22 = vpop.f32.mrb[27].mxu0  ;;  %v2762_v25 = vpop.f32.mrb[25].mxu1  ;;  %v2311_v8 = vld [vmem:[%s4527_s11] sm:$0xff] }
 0x5be   :  { %v2722_v33 = vadd.f32 %v2721_v22, %v2720_v21  ;;  %v2763_v34 = vadd.f32 %v2762_v25, %v2761_v11  ;;  %v1933_v37 = vmul.f32 %v1929_v36, %v1887_v5  ;;  %v2313_v36 = vld [vmem:[%s4527_s11 + $0x10] sm:$0xf] }
 0x5c0   :  { %v1892_v45 = vadd.f32 %v2763_v34, %v2719_v63  ;;  %v2723_v46 = vpop.f32.mrb[28].mxu0  ;;  %v2764_v50 = vpop.f32.mrb[26].mxu1  ;;  %v1937_v57 = vsel %vm933_vm9, %v1933_v37, 0.0  ;;  %v2312_v63 = vld [vmem:[%s4527_s11 + $0x8] sm:$0xff] }
 0x5c1   :  { %v2724_v49 = vpop.f32.mrb[29].mxu0  ;;  %v2765_v0 = vpop.f32.mrb[27].mxu1  ;;  %1938 = vadd.xlane.f32.xlu0 %v1937_v57 }
 0x5c2   :  { %v2725_v12 = vadd.f32 %v2724_v49, %v2723_v46  ;;  %v2766_v47 = vadd.f32 %v2765_v0, %v2764_v50  ;;  %v1934_v1 = vmul.f32 %v1930_v38, %v1892_v45 }
 0x5c4   :  { %v1897_v23 = vadd.f32 %v2766_v47, %v2722_v33  ;;  %v2767_v41 = vpop.f32.mrb[28].mxu1  ;;  %v1940_v17 = vsel %vm933_vm9, %v1934_v1, 0.0 }
 0x5c5   :  { %v2768_v6 = vpop.f32.mrb[29].mxu1  ;;  %1941 = vadd.xlane.f32.xlu1 %v1940_v17  ;;  %1920 = vadd.xlane.f32.xlu0 %v1919_v31 }
 0x5c6   :  { %v2769_v44 = vadd.f32 %v2768_v6, %v2767_v41  ;;  %v1935_v28 = vmul.f32 %v1931_v9, %v1897_v23 }
 0x5c8   :  { %v1902_v40 = vadd.f32 %v2769_v44, %v2725_v12  ;;  %v1943_v48 = vsel %vm933_vm9, %v1935_v28, 0.0 }
 0x5c9   :  { %1944 = vadd.xlane.f32.xlu1 %v1943_v48  ;;  %1923 = vadd.xlane.f32.xlu0 %v1922_v43 }
 0x5ca   :  { %v1936_v20 = vmul.f32 %v1932_v54, %v1902_v40 }
 0x5cc   :  { %v1946_v2 = vsel %vm933_vm9, %v1936_v20, 0.0 }
 0x5cd   :  { %1947 = vadd.xlane.f32.xlu0 %v1946_v2 }
 0x5da   :  { %2044 = vperm.xlu1 %3289, %v2006_v18  }
 0x5de   :  { %2049 = vperm.xlu1 %3289, %v2007_v13  }
 0x5e2   :  { %2089 = vperm.xlu1 %3289, %v2079_v10  }
 0x5e3   :  { %2084 = vperm.xlu0 %3288, %v2078_v53  }
 0x5e6   :  { %2094 = vperm.xlu1 %3289, %v2080_v61  }
 0x5e7   :  { %2054 = vperm.xlu0 %3288, %v2008_v59  }
 0x5ea   :  { %2099 = vperm.xlu1 %3289, %v2081_v35  }
 0x5eb   :  { %2059 = vperm.xlu0 %3288, %v2009_v62  }
 0x5ee   :  { %2321 = vperm.xlu1 %3289, %v2312_v63  }
 0x5ef   :  { %2316 = vperm.xlu0 %3288, %v2311_v8  }
 0x5f3   :  { %2326 = vperm.xlu0 %3288, %v2313_v36  }
 0x62e   :  { %v1915_v5 = vpop.xlane.xlu0 %1914 }
 0x62f   :  { %v4443_v21 = vmul.f32 0.001953125, %v1915_v5 }
 0x631   :  { %v1949_v22 = vmul.f32 512.0, %v4443_v21 }
 0x632   :  { %v1918_v11 = vpop.xlane.xlu1 %1917 }
 0x633   :  { %v4446_v25 = vmul.f32 0.001953125, %v1918_v11  ;;  %v1953_v26 = vmul.f32 %v1949_v22, %v4443_v21 }
 0x635   :  { %v1950_v33 = vmul.f32 512.0, %v4446_v25 }
 0x637   :  { %v1954_v45 = vmul.f32 %v1950_v33, %v4446_v25  ;;  %v2011_v33 = vsub.f32 %v4250_v42, %v4443_v21 }
 0x64e   :  { %v1939_v34 = vpop.xlane.xlu0 %1938 }
 0x64f   :  { %v1957_v37 = vsub.f32 %v1939_v34, %v1953_v26  ;;  %v2010_v26 = vsub.f32 %v4248_v32, %v4443_v21 }
 0x651   :  { %v1962_v38 = vmul.f32 0.0019569471, %v1957_v37  ;;  %v2012_v37 = vsub.f32 %v4257_v39, %v4443_v21  ;;  %v2015_v39 = vsub.f32 %v4259_v29, %v4446_v25 }
 0x652   :  { %v1942_v46 = vpop.xlane.xlu1 %1941  ;;  %v1921_v50 = vpop.xlane.xlu0 %1920 }
 0x653   :  { %v1966_v57 = vmax.f32 %v1962_v38, 0.0  ;;  %v1958_v58 = vsub.f32 %v1942_v46, %v1954_v45  ;;  %v4451_v49 = vmul.f32 0.001953125, %v1921_v50  ;;  %v2013_v38 = vsub.f32 %v4261_v7, %v4443_v21 }
 0x655   :  { %3292 = vrsqrt.f32 %v1966_v57  ;;  %v1963_v0 = vmul.f32 0.0019569471, %v1958_v58  ;;  %v1951_v16 = vmul.f32 512.0, %v4451_v49  ;;  %vm1972_vm10 = vcmp.eq.f32.partialorder %v1966_v57, inf }
 0x656   :  { %v1924_v12 = vpop.xlane.xlu0 %1923  ;;  %v1945_v41 = vpop.xlane.xlu1 %1944  ;;  %v1975_v43 = vand.u32 2147483648, %v1966_v57  ;;  %vm1974_vm11 = vcmp.eq.f32.partialorder %v1966_v57, 0.0 }
 0x657   :  { %v4454_v47 = vmul.f32 0.001953125, %v1924_v12  ;;  %v1967_v1 = vmax.f32 %v1963_v0, 0.0  ;;  %v1955_v9 = vmul.f32 %v1951_v16, %v4451_v49 }
 0x659   :  { %v1952_v23 = vmul.f32 512.0, %v4454_v47  ;;  %3294 = vrsqrt.f32 %v1967_v1  ;;  %v1959_v17 = vsub.f32 %v1945_v41, %v1955_v9  ;;  %vm1979_vm12 = vcmp.eq.f32.partialorder %v1967_v1, inf }
 0x65a   :  { %v1948_v52 = vpop.xlane.xlu0 %1947  ;;  %v1982_v61 = vand.u32 2147483648, %v1967_v1  ;;  %vm1981_vm13 = vcmp.eq.f32.partialorder %v1967_v1, 0.0  ;;  %v2045_v5 = vpop.permute.xlu1 %2044 }
 0x65b   :  { %v1956_v31 = vmul.f32 %v1952_v23, %v4454_v47  ;;  %v1964_v6 = vmul.f32 0.0019569471, %v1959_v17  ;;  %v2017_v17 = vsub.f32 %v4276_v51, %v4446_v25  ;;  %v2018_v51 = vsub.f32 %v4270_v27, %v4451_v49 }
 0x65d   :  { %v1960_v44 = vsub.f32 %v1948_v52, %v1956_v31  ;;  %v1968_v54 = vmax.f32 %v1964_v6, 0.0 }
 0x65e   :  { %v2050_v21 = vpop.permute.xlu1 %2049 }
 0x65f   :  { %v3293_v28 = vpop.eup %3292  ;;  %v1965_v40 = vmul.f32 0.0019569471, %v1960_v44  ;;  %3296 = vrsqrt.f32 %v1968_v54  ;;  %vm1986_vm14 = vcmp.eq.f32.partialorder %v1968_v54, inf  ;;  %v1989_v36 = vand.u32 2147483648, %v1968_v54 }
 0x660   :  { %v1971_v48 = vmul.f32 %v3293_v28, %v1966_v57  ;;  %vm1988_vm15 = vcmp.eq.f32.partialorder %v1968_v54, 0.0 }
 0x661   :  { %v1969_v2 = vmax.f32 %v1965_v40, 0.0 }
 0x662   :  { %v1973_v20 = vsel %vm1972_vm10, %v1966_v57, %v1971_v48  ;;  %v2014_v57 = vsub.f32 %v4255_v30, %v4446_v25  ;;  %v2016_v30 = vsub.f32 %v4272_v56, %v4446_v25  ;;  %v2085_v31 = vpop.permute.xlu0 %2084 }
 0x663   :  { %v1976_v18 = vsel %vm1974_vm11, %v1975_v43, %v1973_v20  ;;  %v3295_v13 = vpop.eup %3294  ;;  %3298 = vrsqrt.f32 %v1969_v2  ;;  %vm1993_vm0 = vcmp.eq.f32.partialorder %v1969_v2, inf  ;;  %v1996_v12 = vand.u32 2147483648, %v1969_v2 }
 0x664   :  { %v1998_v10 = vadd.f32 1e-05, %v1976_v18  ;;  %v1978_v53 = vmul.f32 %v3295_v13, %v1967_v1  ;;  %vm1995_vm1 = vcmp.eq.f32.partialorder %v1969_v2, 0.0 }
 0x666   :  { %3300 = vrcp.f32 %v1998_v10  ;;  %v1980_v59 = vsel %vm1979_vm12, %v1967_v1, %v1978_v53  ;;  %v2090_v53 = vpop.permute.xlu1 %2089 }
 0x667   :  { %v1983_v35 = vsel %vm1981_vm13, %v1982_v61, %v1980_v59 }
 0x668   :  { %v1999_v62 = vadd.f32 1e-05, %v1983_v35 }
 0x669   :  { %v3297_v63 = vpop.eup %3296 }
 0x66a   :  { %3302 = vrcp.f32 %v1999_v62  ;;  %v1985_v8 = vmul.f32 %v3297_v63, %v1968_v54 }
 0x66c   :  { %v1987_v22 = vsel %vm1986_vm14, %v1968_v54, %v1985_v8  ;;  %v2019_v8 = vsub.f32 %v4274_v15, %v4451_v49 }
 0x66d   :  { %v3299_v11 = vpop.eup %3298  ;;  %v1990_v34 = vsel %vm1988_vm15, %v1989_v36, %v1987_v22  ;;  %v2020_v36 = vsub.f32 %v4288_v60, %v4451_v49 }
 0x66e   :  { %v1992_v45 = vmul.f32 %v3299_v11, %v1969_v2  ;;  %v2000_v50 = vadd.f32 1e-05, %v1990_v34 }
 0x670   :  { %v3301_v46 = vpop.eup %3300  ;;  %3304 = vrcp.f32 %v2000_v50  ;;  %v1994_v42 = vsel %vm1993_vm0, %v1969_v2, %v1992_v45  ;;  %v2095_v50 = vpop.permute.xlu1 %2094 }
 0x671   :  { %v2026_v58 = vmul.f32 %v3301_v46, %v2010_v26  ;;  %v2027_v0 = vmul.f32 %v3301_v46, %v2011_v33  ;;  %v2028_v32 = vmul.f32 %v3301_v46, %v2012_v37  ;;  %v2029_v16 = vmul.f32 %v3301_v46, %v2013_v38  ;;  %v2055_v46 = vpop.permute.xlu0 %2054 }
 0x672   :  { %v1997_v41 = vsel %vm1995_vm1, %v1996_v12, %v1994_v42 }
 0x673   :  { %v2062_v1 = vmul.f32 %v2045_v5, %v2026_v58  ;;  %v2063_v9 = vmul.f32 %v2045_v5, %v2027_v0  ;;  %v2064_v7 = vmul.f32 %v2045_v5, %v2028_v32  ;;  %v2065_v23 = vmul.f32 %v2045_v5, %v2029_v16 }
 0x674   :  { %v3303_v52 = vpop.eup %3302  ;;  %v2001_v6 = vadd.f32 1e-05, %v1997_v41  ;;  %v2021_v5 = vsub.f32 %v4292_v55, %v4451_v49  ;;  %v2022_v55 = vsub.f32 %v4286_v19, %v4454_v47  ;;  %v2023_v49 = vsub.f32 %v4290_v3, %v4454_v47 }
 0x675   :  { %v2102_v44 = vadd.f32 %v2085_v31, %v2062_v1  ;;  %v2104_v28 = vadd.f32 %v2085_v31, %v2064_v7  ;;  %v2103_v54 = vadd.f32 %v2085_v31, %v2063_v9  ;;  %v2030_v29 = vmul.f32 %v3303_v52, %v2014_v57  ;;  %v2060_v19 = vpop.permute.xlu0 %2059 }
 0x676   :  { %v2031_v40 = vmul.f32 %v3303_v52, %v2015_v39  ;;  %v2032_v48 = vmul.f32 %v3303_v52, %v2016_v30  ;;  %v2033_v43 = vmul.f32 %v3303_v52, %v2017_v17  ;;  %3306 = vrcp.f32 %v2001_v6 }
 0x677   :  { %v2118_v20 = vmax.f32 %v2102_v44, 0.0  ;;  %v2119_v2 = vmax.f32 %v2103_v54, 0.0  ;;  %v2066_v18 = vmul.f32 %v2050_v21, %v2030_v29  ;;  %v2120_v61 = vmax.f32 %v2104_v28, 0.0 }
 0x678   :  { %v2067_v13 = vmul.f32 %v2050_v21, %v2031_v40  ;;  %v2068_v10 = vmul.f32 %v2050_v21, %v2032_v48  ;;  %v2069_v56 = vmul.f32 %v2050_v21, %v2033_v43  ;;  %v2105_v25 = vadd.f32 %v2085_v31, %v2065_v23 }
 0x679   :  { %2198 = vmatprep.mubr.f32.mxu0 %v2119_v2  ;;  %v2106_v62 = vadd.f32 %v2090_v53, %v2066_v18  ;;  %v2024_v32 = vsub.f32 %v4304_v4, %v4454_v47  ;;  %v2025_v16 = vsub.f32 %v4306_v24, %v4454_v47  ;;  %v2100_v47 = vpop.permute.xlu1 %2099  ;;  %v3318_v2 = vmov 0.0|0.0  }
 0x67a   :  { %2199 = vmatmul.mubr.f32.vlgmr.msra.gmra.mrb[30].mxu0 %v2118_v20  ;;  %v2107_v59 = vadd.f32 %v2090_v53, %v2067_v13  ;;  %v2109_v35 = vadd.f32 %v2090_v53, %v2069_v56  ;;  %v2108_v63 = vadd.f32 %v2090_v53, %v2068_v10  ;;  %v2121_v11 = vmax.f32 %v2105_v25, 0.0  ;;  %v3305_v22 = vpop.eup %3304  ;;  %3266 = vmatprep.subr.bf16.mxu0 %v3318_v2 }
 0x67b   :  { %v2122_v33 = vmax.f32 %v2106_v62, 0.0  ;;  %v2034_v34 = vmul.f32 %v3305_v22, %v2018_v51  ;;  %v2035_v37 = vmul.f32 %v3305_v22, %v2019_v8  ;;  %v2036_v38 = vmul.f32 %v3305_v22, %v2020_v36  ;;  %3272 = vmatprep.subr.bf16.mxu1 %v3318_v2 }
 0x67c   :  { %v2123_v26 = vmax.f32 %v2107_v59, 0.0  ;;  %v2125_v27 = vmax.f32 %v2109_v35, 0.0  ;;  %v2037_v45 = vmul.f32 %v3305_v22, %v2021_v5  ;;  %2283 = vmatprep.mubr.f32.mxu1 %v2121_v11  ;;  %v2124_v15 = vmax.f32 %v2108_v63, 0.0 }
 0x67d   :  { %2284 = vmatmul.mubr.f32.vlgmr.msra.gmra.mrb[30].mxu1 %v2120_v61  ;;  %v2070_v57 = vmul.f32 %v2055_v46, %v2034_v34  ;;  %v2071_v60 = vmul.f32 %v2055_v46, %v2035_v37  ;;  %v2072_v58 = vmul.f32 %v2055_v46, %v2036_v38 }
 0x67e   :  { %2203 = vmatprep.mubr.f32.mxu0 %v2123_v26  ;;  %v2073_v0 = vmul.f32 %v2055_v46, %v2037_v45  ;;  %2288 = vmatprep.mubr.f32.mxu1 %v2125_v27 }
 0x67f   :  { %2204 = vmatmul.mubr.f32.gmra.mrb[32].mxu0 %v2122_v33  ;;  %v2111_v12 = vadd.f32 %v2095_v50, %v2071_v60  ;;  %v2110_v1 = vadd.f32 %v2095_v50, %v2070_v57  ;;  %v2112_v9 = vadd.f32 %v2095_v50, %v2072_v58 }
 0x680   :  { %v3307_v42 = vpop.eup %3306  ;;  %v2113_v39 = vadd.f32 %v2095_v50, %v2073_v0 }
 0x681   :  { %v2038_v7 = vmul.f32 %v3307_v42, %v2022_v55  ;;  %v2039_v21 = vmul.f32 %v3307_v42, %v2023_v49  ;;  %v2040_v23 = vmul.f32 %v3307_v42, %v2024_v32  ;;  %v2041_v41 = vmul.f32 %v3307_v42, %v2025_v16  ;;  %2289 = vmatmul.mubr.f32.gmra.mrb[32].mxu1 %v2124_v15  ;;  %v2308_v16 = vld [vmem:[%s4528_s10] sm:$0xff]  ;;  %v2309_v42 = vld [vmem:[%s4528_s10 + $0x8] sm:$0xff] }
 0x682   :  { %v2127_v30 = vmax.f32 %v2111_v12, 0.0  ;;  %v2129_v3 = vmax.f32 %v2113_v39, 0.0  ;;  %v2126_v17 = vmax.f32 %v2110_v1, 0.0  ;;  %v2128_v31 = vmax.f32 %v2112_v9, 0.0  ;;  %v2310_v12 = vld [vmem:[%s4528_s10 + $0x10] sm:$0xf]  ;;  %v2317_v39 = vpop.permute.xlu0 %2316  ;;  %v2322_v1 = vpop.permute.xlu1 %2321 }
 0x683   :  { %v2074_v4 = vmul.f32 %v2060_v19, %v2038_v7  ;;  %v2075_v52 = vmul.f32 %v2060_v19, %v2039_v21  ;;  %v2076_v6 = vmul.f32 %v2060_v19, %v2040_v23  ;;  %v2077_v24 = vmul.f32 %v2060_v19, %v2041_v41 }
 0x684   :  { %2208 = vmatprep.mubr.f32.mxu0 %v2127_v30  ;;  %2293 = vmatprep.mubr.f32.mxu1 %v2129_v3 }
 0x685   :  { %2209 = vmatmul.mubr.f32.gmra.mrb[34].mxu0 %v2126_v17  ;;  %2294 = vmatmul.mubr.f32.gmra.mrb[34].mxu1 %v2128_v31  ;;  %v2115_v44 = vadd.f32 %v2100_v47, %v2075_v52  ;;  %v2117_v28 = vadd.f32 %v2100_v47, %v2077_v24  ;;  %v2114_v54 = vadd.f32 %v2100_v47, %v2074_v4 }
 0x686   :  { %v2116_v29 = vadd.f32 %v2100_v47, %v2076_v6 }
 0x687   :  { %v2131_v40 = vmax.f32 %v2115_v44, 0.0  ;;  %v2133_v48 = vmax.f32 %v2117_v28, 0.0  ;;  %v2130_v43 = vmax.f32 %v2114_v54, 0.0 }
 0x688   :  { %v2132_v20 = vmax.f32 %v2116_v29, 0.0 }
 0x689   :  { %2213 = vmatprep.mubr.f32.mxu0 %v2131_v40  ;;  %2298 = vmatprep.mubr.f32.mxu1 %v2133_v48 }
 0x68a   :  { %2214 = vmatmul.mubr.f32.gmra.mrb[36].mxu0 %v2130_v43  ;;  %2299 = vmatmul.mubr.f32.gmra.mrb[36].mxu1 %v2132_v20 }
 0x68b   :  { %2873 = vmatprep.mubr.msk.f32.mxu0 %vm3319_vm2, %v4562_v14  ;;  %2876 = vmatprep.mubr.msk.f32.mxu1 %vm3319_vm2, %v4562_v14 }
 0x74d   :  { %v2802_v18 = vpop.f32.mrb[30].mxu0 }
 0x74e   :  { %v2803_v13 = vpop.f32.mrb[31].mxu0 }
 0x74f   :  { %v2804_v10 = vadd.f32 %v2803_v13, %v2802_v18 }
 0x750   :  { %v2846_v56 = vpop.f32.mrb[30].mxu1 }
 0x751   :  { %v2847_v53 = vpop.f32.mrb[31].mxu1 }
 0x752   :  { %v2848_v61 = vadd.f32 %v2847_v53, %v2846_v56  ;;  %v2805_v51 = vpop.f32.mrb[32].mxu0 }
 0x753   :  { %v2806_v25 = vpop.f32.mrb[33].mxu0 }
 0x754   :  { %v2286_v59 = vadd.f32 %v2848_v61, %v2804_v10  ;;  %v2849_v35 = vpop.f32.mrb[32].mxu1  ;;  %v2807_v62 = vadd.f32 %v2806_v25, %v2805_v51 }
 0x755   :  { %v2850_v63 = vpop.f32.mrb[33].mxu1 }
 0x756   :  { %v2851_v8 = vadd.f32 %v2850_v63, %v2849_v35  ;;  %v2304_v27 = vmul.f32 0.00390625, %v2286_v59 }
 0x758   :  { %v2291_v36 = vadd.f32 %v2851_v8, %v2807_v62  ;;  %v2808_v5 = vpop.f32.mrb[34].mxu0  ;;  %v2852_v11 = vpop.f32.mrb[34].mxu1 }
 0x759   :  { %v2809_v22 = vpop.f32.mrb[35].mxu0  ;;  %v2853_v26 = vpop.f32.mrb[35].mxu1 }
 0x75a   :  { %v2305_v33 = vmul.f32 0.00390625, %v2291_v36  ;;  %v2810_v34 = vadd.f32 %v2809_v22, %v2808_v5  ;;  %v2854_v37 = vadd.f32 %v2853_v26, %v2852_v11 }
 0x75c   :  { %v3267_v38 = vpack.c.bf16 %v2305_v33, %v2304_v27  ;;  %v2296_v45 = vadd.f32 %v2854_v37, %v2810_v34 }
 0x75d   :  { %v2811_v46 = vpop.f32.mrb[36].mxu0  ;;  %v2855_v15 = vpop.f32.mrb[36].mxu1 }
 0x75e   :  { %3268 = vmatpush3.bf16.msra.mxu0 %v3267_v38  ;;  %3274 = vmatpush3.bf16.msra.mxu1 %v3267_v38  ;;  %v2812_v50 = vpop.f32.mrb[37].mxu0  ;;  %v2856_v57 = vpop.f32.mrb[37].mxu1  ;;  %v2306_v55 = vmul.f32 0.00390625, %v2296_v45 }
 0x75f   :  { %v2813_v60 = vadd.f32 %v2812_v50, %v2811_v46  ;;  %v2857_v58 = vadd.f32 %v2856_v57, %v2855_v15  ;;  %3269 = vmatprep.subr.bf16.mxu0 %v3318_v2  ;;  %3273 = vmatprep.subr.bf16.mxu1 %v3318_v2 }
 0x761   :  { %v2301_v0 = vadd.f32 %v2857_v58, %v2813_v60 }
 0x763   :  { %v2307_v49 = vmul.f32 0.00390625, %v2301_v0 }
 0x765   :  { %v3270_v32 = vpack.c.bf16 %v2307_v49, %v2306_v55 }
 0x767   :  { %3271 = vmatpush3.bf16.msra.mxu0 %v3270_v32  ;;  %3275 = vmatpush3.bf16.msra.mxu1 %v3270_v32 }
 0x76a   :  { %2874 = vmatmul.mubr.msk.f32.vlgmr.msra.gmra.mrb[38].mxu0 %vm2329_vm3, %v2308_v16  ;;  %2877 = vmatmul.mubr.msk.f32.vlgmr.msra.gmra.mrb[38].mxu1 %vm2329_vm3, %v2309_v42 }
 0x76b   :  { %2879 = vmatprep.mubr.msk.f32.mxu1 %vm3319_vm2, %v4562_v14  ;;  %v2327_v14 = vpop.permute.xlu0 %2326 }
 0x76e   :  { %2880 = vmatmul.mubr.msk.f32.gmra.mrb[40].mxu1 %vm2329_vm3, %v2310_v12 }
 0x83d   :  { %v2405_v9 = vpop.f32.mrb[38].mxu0  ;;  %v2410_v7 = vpop.f32.mrb[38].mxu1 }
 0x83e   :  { %v2406_v21 = vadd.f32 %v2405_v9, %v2317_v39  ;;  %v2411_v23 = vadd.f32 %v2410_v7, %v2322_v1  ;;  %v2878_v41 = vpop.f32.mrb[39].mxu1  ;;  %v2875_v19 = vpop.f32.mrb[39].mxu0 }
 0x840   :  { %2419 = vst.msk [vmem:[%s4529_s12] sm:$0xff] %vm933_vm9, %v2406_v21  ;;  %2420 = vst.msk [vmem:[%s4529_s12 + $0x8] sm:$0xff] %vm933_vm9, %v2411_v23 }
 0x841   :  { %v2415_v30 = vpop.f32.mrb[40].mxu1 }
 0x842   :  { %v2416_v3 = vadd.f32 %v2415_v30, %v2327_v14  ;;  %v2881_v17 = vpop.f32.mrb[41].mxu1 }
 0x844   :  { %2422 = vst.msk [vmem:[%s4529_s12 + $0x10] sm:$0xf] %vm2421_vm4, %v2416_v3 }

</bundles_post_ra>
